<compile_context>
chip_gen: v5e
topology: v5e:2x2
jax: 0.10.0
libtpu: 0.0.40
codegen_flags: <defaults>
</compile_context>

<pallas_src>
import math
from functools import partial

import numpy as np
import jax
import jax.numpy as jnp
from jax.experimental import pallas as pl
from jax.experimental.pallas import tpu as pltpu

LANE = 128
BN_EPS = 1e-5
LEAKY_SLOPE = 0.01  # nn.LeakyReLU() default


# ----------------------------- kernels ------------------------------------- #

def _linear_bn_act_kernel(x_ref, w_ref, b_ref, g_ref, beta_ref, o_ref, *, leaky):
    # Linear: bf16 operands on the MXU, f32 accumulation.
    y = jnp.dot(x_ref[...], w_ref[...], preferred_element_type=jnp.float32)
    y = y + b_ref[...]                                    # (N, TN) + (1, TN), f32

    # BatchNorm1d (training mode): batch mean / biased variance, all in f32.
    mean = jnp.mean(y, axis=0, keepdims=True)
    centered = y - mean
    var = jnp.mean(centered * centered, axis=0, keepdims=True)
    y = centered * jax.lax.rsqrt(var + BN_EPS)
    y = y * g_ref[...] + beta_ref[...]                    # gamma=0.975, beta=0.125

    # Dropout is treated as identity.  LeakyReLU where requested.
    # TODO(synk): stochastic train-mode Dropout (p=dropout) not implemented.
    if leaky:
        y = jnp.where(y >= 0, y, LEAKY_SLOPE * y)

    o_ref[...] = y.astype(o_ref.dtype)


def _linear_kernel(x_ref, w_ref, b_ref, o_ref):
    y = jnp.dot(x_ref[...], w_ref[...], preferred_element_type=jnp.float32)
    y = y + b_ref[...]
    o_ref[...] = y.astype(o_ref.dtype)


# ----------------------------- wrapper -------------------------------------- #

def _pallas_linear(x, w_t, b, gamma=None, beta=None, *, bn, leaky=False,
                   out_dtype=jnp.bfloat16, tile_n=LANE):
    """y = x @ w_t + b  [+ BatchNorm1d(train) [+ LeakyReLU]], tiled over F_out."""
    n, f_in = x.shape
    f_out = w_t.shape[1]
    assert f_out % tile_n == 0, (f_out, tile_n)
    grid = (f_out // tile_n,)

    # Full batch + full contraction per feature tile (exact for BN over axis 0);
    # only the weight / bias / output stream over the feature grid axis.
    x_spec = pl.BlockSpec((n, f_in), lambda j: (0, 0))
    w_spec = pl.BlockSpec((f_in, tile_n), lambda j: (0, j))
    vec_spec = pl.BlockSpec((1, tile_n), lambda j: (0, j))
    out_spec = pl.BlockSpec((n, tile_n), lambda j: (0, j))

    out_itemsize = np.dtype(out_dtype).itemsize
    in_bytes = (x.size * x.dtype.itemsize + w_t.size * w_t.dtype.itemsize
                + b.size * b.dtype.itemsize
                + (gamma.size * 4 + beta.size * 4 if bn else 0))
    cost = pl.CostEstimate(
        flops=2 * n * f_in * f_out,
        transcendentals=f_out if bn else 0,
        bytes_accessed=in_bytes + n * f_out * out_itemsize,
    )

    # VMEM budget: double-buffered blocks + generous headroom, well under the
    # 32 MiB default scoped limit (and v7x's 64 MiB physical VMEM).
    block_bytes = (n * f_in * x.dtype.itemsize
                   + f_in * tile_n * w_t.dtype.itemsize
                   + (3 if bn else 1) * tile_n * 4
                   + n * tile_n * out_itemsize)
    vmem_limit = min(4 * block_bytes + (4 << 20), 32 << 20)

    compiler_params = pltpu.CompilerParams(
        dimension_semantics=("parallel",),   # feature tiles are independent (2 TCs on v7x)
        vmem_limit_bytes=int(vmem_limit),
    )

    if bn:
        kernel = partial(_linear_bn_act_kernel, leaky=leaky)
        in_specs = [x_spec, w_spec, vec_spec, vec_spec, vec_spec]
        args = (x, w_t, b, gamma, beta)
    else:
        kernel = _linear_kernel
        in_specs = [x_spec, w_spec, vec_spec]
        args = (x, w_t, b)

    return pl.pallas_call(
        kernel,
        out_shape=jax.ShapeDtypeStruct((n, f_out), out_dtype),
        grid=grid,
        in_specs=in_specs,
        out_specs=out_spec,
        compiler_params=compiler_params,
        cost_estimate=cost,
    )(*args)


# ----------------------------- params / forward ----------------------------- #

def _xavier_uniform_t(key, f_in, f_out, dtype=jnp.float32):
    # nn.init.xavier_uniform_ on a (f_out, f_in) torch weight; stored here
    # pre-transposed as (f_in, f_out) so the hot path needs no transpose.
    bound = math.sqrt(6.0 / (f_in + f_out))
    return jax.random.uniform(key, (f_in, f_out), dtype=dtype,
                              minval=-bound, maxval=bound)


def _pad_features(a, multiple=LANE):
    pad = (-a.shape[-1]) % multiple
    if pad:
        a = jnp.pad(a, [(0, 0)] * (a.ndim - 1) + [(0, pad)])
    return a


def init_params(key, in_shape, n_meta, layer1, layer2, nb_classes, n_emb=0,
                compute_dtype=jnp.bfloat16):
    """Deterministic params mirroring SHAPAutoEncoder2.__init__ + random_init(xavier)."""
    d_in = in_shape + n_meta
    d_cls = layer2 + n_emb
    k1, k2, k3, k4 = jax.random.split(key, 4)
    bn = lambda d: dict(gamma=jnp.full((1, d), 0.975, jnp.float32),
                        beta=jnp.full((1, d), 0.125, jnp.float32))
    params = {
        "enc1": dict(w=_xavier_uniform_t(k1, d_in, layer1).astype(compute_dtype),
                     b=jnp.zeros((1, layer1), jnp.float32), **bn(layer1)),
        "enc2": dict(w=_xavier_uniform_t(k2, layer1, layer2).astype(compute_dtype),
                     b=jnp.zeros((1, layer2), jnp.float32), **bn(layer2)),
        "cls2": dict(w=_xavier_uniform_t(k3, d_cls, d_cls).astype(compute_dtype),
                     b=jnp.zeros((1, d_cls), jnp.float32)),
        # tiny last layer: pad output features to a lane-dense multiple of 128
        "cls3": dict(w=_pad_features(_xavier_uniform_t(k4, d_cls, nb_classes)
                                     ).astype(compute_dtype),
                     b=_pad_features(jnp.zeros((1, nb_classes), jnp.float32))),
    }
    return params


def shap_autoencoder2_forward(params, x, nb_classes):
    compute = jnp.bfloat16
    x_b = x.astype(compute)

    # enc.linear1: Linear -> BatchNorm1d -> Dropout(identity) -> LeakyReLU
    h1 = _pallas_linear(x_b, params["enc1"]["w"], params["enc1"]["b"],
                        params["enc1"]["gamma"], params["enc1"]["beta"],
                        bn=True, leaky=True, out_dtype=compute)
    # enc.linear2: Linear -> BatchNorm1d
    enc = _pallas_linear(h1, params["enc2"]["w"], params["enc2"]["b"],
                         params["enc2"]["gamma"], params["enc2"]["beta"],
                         bn=True, leaky=False, out_dtype=compute)
    # classifier.linear2: Linear (n_layers=2 -> square layer)
    c = _pallas_linear(enc, params["cls2"]["w"], params["cls2"]["b"],
                       bn=False, out_dtype=compute)
    # classifier.linear3: Linear -> nb_classes (padded to 128 lanes, slice after)
    logits = _pallas_linear(c, params["cls3"]["w"], params["cls3"]["b"],
                            bn=False, out_dtype=jnp.float32)
    return logits[:, :nb_classes]


# ----------------------------- pure-JAX reference --------------------------- #

def reference_forward(params, x, nb_classes):
    compute = jnp.bfloat16

    def linear(h, w, b):
        return jnp.dot(h.astype(compute), w.astype(compute),
                       preferred_element_type=jnp.float32) + b

    def bnorm(y, gamma, beta):
        mean = jnp.mean(y, axis=0, keepdims=True)
        var = jnp.mean((y - mean) ** 2, axis=0, keepdims=True)   # biased
        return (y - mean) * jax.lax.rsqrt(var + BN_EPS) * gamma + beta

    h1 = bnorm(linear(x, params["enc1"]["w"], params["enc1"]["b"]),
               params["enc1"]["gamma"], params["enc1"]["beta"])
    h1 = jnp.where(h1 >= 0, h1, LEAKY_SLOPE * h1).astype(compute)

    enc = bnorm(linear(h1, params["enc2"]["w"], params["enc2"]["b"]),
                params["enc2"]["gamma"], params["enc2"]["beta"]).astype(compute)

    c = linear(enc, params["cls2"]["w"], params["cls2"]["b"]).astype(compute)
    logits = linear(c, params["cls3"]["w"], params["cls3"]["b"])
    return logits[:, :nb_classes]


# ----------------------------- demo ----------------------------------------- #

if __name__ == "__main__":
    key = jax.random.PRNGKey(0)
    k_x, k_p = jax.random.split(key)

    batch = 128          # M >= 128 so the MXU contraction is not overhead-dominated
    in_shape = 256       # lane-dense (multiple of 128)
    n_meta = 0
    n_emb = 0
    layer1 = 256
    layer2 = 128
    nb_classes = 9

    x = jax.random.normal(k_x, (batch, in_shape + n_meta), dtype=jnp.float32)
    params = init_params(k_p, in_shape, n_meta, layer1, layer2, nb_classes, n_emb)

    fwd = jax.jit(partial(shap_autoencoder2_forward, nb_classes=nb_classes))
    out = jax.block_until_ready(fwd(params, x))

    ref = reference_forward(params, x, nb_classes)
    assert out.shape == (batch, nb_classes), out.shape
    max_err = float(jnp.max(jnp.abs(out - ref)))
    assert jnp.allclose(out, ref, atol=2e-2, rtol=2e-2), max_err

    print("KERNEL_OK")
</pallas_src>

<mosaic_0001>
module attributes {stable_mosaic.version = 11 : i64} {
  func.func @_linear_kernel(%arg0: i32, %arg1: memref<128x128xbf16, #tpu.memory_space<vmem>>, %arg2: memref<128x128xbf16, #tpu.memory_space<vmem>>, %arg3: memref<1x128xf32, #tpu.memory_space<vmem>>, %arg4: memref<128x128xbf16, #tpu.memory_space<vmem>>) attributes {dimension_semantics = [#tpu.dimension_semantics<parallel>], iteration_bounds = array<i64: 1>, scalar_prefetch = 0 : i64, scratch_operands = 0 : i64, tpu.core_type = #tpu.core_type<tc>, window_params = [{pipeline_mode = #tpu.pipeline_mode<synchronous>, transform_indices = @transform_0, window_bounds = array<i64: 128, 128>}, {transform_indices = @transform_1, window_bounds = array<i64: 128, 128>}, {transform_indices = @transform_2, window_bounds = array<i64: 1, 128>}, {transform_indices = @transform_3, window_bounds = array<i64: 128, 128>}]} {
    %c0 = arith.constant 0 : index
    %c0_0 = arith.constant 0 : index
    %0 = vector.load %arg1[%c0, %c0_0] : memref<128x128xbf16, #tpu.memory_space<vmem>>, vector<128x128xbf16>
    %c0_1 = arith.constant 0 : index
    %c0_2 = arith.constant 0 : index
    %1 = vector.load %arg2[%c0_1, %c0_2] : memref<128x128xbf16, #tpu.memory_space<vmem>>, vector<128x128xbf16>
    %cst = arith.constant dense<0.000000e+00> : vector<128x128xf32>
    %2 = tpu.matmul %0, %1, %cst {dimension_numbers = #tpu.dot_dimension_numbers<[1], [0], [0], [1], [0, 0, 1, 1], [], []>} : vector<128x128xbf16>, vector<128x128xbf16>, vector<128x128xf32> -> vector<128x128xf32>
    %c0_3 = arith.constant 0 : index
    %c0_4 = arith.constant 0 : index
    %3 = vector.load %arg3[%c0_3, %c0_4] : memref<1x128xf32, #tpu.memory_space<vmem>>, vector<1x128xf32>
    %4 = vector.broadcast %3 : vector<1x128xf32> to vector<128x128xf32>
    %5 = arith.addf %2, %4 : vector<128x128xf32>
    %6 = arith.truncf %5 : vector<128x128xf32> to vector<128x128xbf16>
    %c0_5 = arith.constant 0 : index
    %c0_6 = arith.constant 0 : index
    %7 = vector.load %arg4[%c0_5, %c0_6] : memref<128x128xbf16, #tpu.memory_space<vmem>>, vector<128x128xbf16>
    tpu.vector_store %arg4[%c0_5, %c0_6], %6 {strides = array<i32>} : memref<128x128xbf16, #tpu.memory_space<vmem>>, vector<128x128xbf16>,
    return
  }
  func.func @transform_0(%arg0: i32) -> (i32, i32) {
    %c0_i32 = arith.constant 0 : i32
    %c0_i32_0 = arith.constant 0 : i32
    %c0_i32_1 = arith.constant 0 : i32
    return %c0_i32, %c0_i32_0 : i32, i32
  }
  func.func @transform_1(%arg0: i32) -> (i32, i32) {
    %c0_i32 = arith.constant 0 : i32
    %c0_i32_0 = arith.constant 0 : i32
    return %c0_i32, %arg0 : i32, i32
  }
  func.func @transform_2(%arg0: i32) -> (i32, i32) {
    %c0_i32 = arith.constant 0 : i32
    %c0_i32_0 = arith.constant 0 : i32
    return %c0_i32, %arg0 : i32, i32
  }
  func.func @transform_3(%arg0: i32) -> (i32, i32) {
    %c0_i32 = arith.constant 0 : i32
    %c0_i32_0 = arith.constant 0 : i32
    return %c0_i32, %arg0 : i32, i32
  }
}

module attributes {stable_mosaic.version = 11 : i64} {
  func.func @_linear_bn_act_kernel(%arg0: i32, %arg1: memref<128x256xbf16, #tpu.memory_space<vmem>>, %arg2: memref<256x128xbf16, #tpu.memory_space<vmem>>, %arg3: memref<1x128xf32, #tpu.memory_space<vmem>>, %arg4: memref<1x128xf32, #tpu.memory_space<vmem>>, %arg5: memref<1x128xf32, #tpu.memory_space<vmem>>, %arg6: memref<128x128xbf16, #tpu.memory_space<vmem>>) attributes {dimension_semantics = [#tpu.dimension_semantics<parallel>], iteration_bounds = array<i64: 1>, scalar_prefetch = 0 : i64, scratch_operands = 0 : i64, tpu.core_type = #tpu.core_type<tc>, window_params = [{pipeline_mode = #tpu.pipeline_mode<synchronous>, transform_indices = @transform_0, window_bounds = array<i64: 128, 256>}, {transform_indices = @transform_1, window_bounds = array<i64: 256, 128>}, {transform_indices = @transform_2, window_bounds = array<i64: 1, 128>}, {transform_indices = @transform_3, window_bounds = array<i64: 1, 128>}, {transform_indices = @transform_4, window_bounds = array<i64: 1, 128>}, {transform_indices = @transform_5, window_bounds = array<i64: 128, 128>}]} {
    %c0 = arith.constant 0 : index
    %c0_0 = arith.constant 0 : index
    %0 = vector.load %arg1[%c0, %c0_0] : memref<128x256xbf16, #tpu.memory_space<vmem>>, vector<128x256xbf16>
    %c0_1 = arith.constant 0 : index
    %c0_2 = arith.constant 0 : index
    %1 = vector.load %arg2[%c0_1, %c0_2] : memref<256x128xbf16, #tpu.memory_space<vmem>>, vector<256x128xbf16>
    %cst = arith.constant dense<0.000000e+00> : vector<128x128xf32>
    %2 = tpu.matmul %0, %1, %cst {dimension_numbers = #tpu.dot_dimension_numbers<[1], [0], [0], [1], [0, 0, 1, 1], [], []>} : vector<128x256xbf16>, vector<256x128xbf16>, vector<128x128xf32> -> vector<128x128xf32>
    %c0_3 = arith.constant 0 : index
    %c0_4 = arith.constant 0 : index
    %3 = vector.load %arg3[%c0_3, %c0_4] : memref<1x128xf32, #tpu.memory_space<vmem>>, vector<1x128xf32>
    %4 = vector.broadcast %3 : vector<1x128xf32> to vector<128x128xf32>
    %5 = arith.addf %2, %4 : vector<128x128xf32>
    %cst_5 = arith.constant dense<0.000000e+00> : vector<128xf32>
    %6 = vector.multi_reduction <add>, %5, %cst_5 [0] : vector<128x128xf32> to vector<128xf32>
    %7 = vector.shape_cast %6 : vector<128xf32> to vector<1x128xf32>
    %cst_6 = arith.constant 1.280000e+02 : f32
    %8 = vector.broadcast %cst_6 : f32 to vector<1x128xf32>
    %9 = arith.divf %7, %8 : vector<1x128xf32>
    %10 = vector.broadcast %9 : vector<1x128xf32> to vector<128x128xf32>
    %11 = arith.subf %5, %10 : vector<128x128xf32>
    %12 = arith.mulf %11, %11 : vector<128x128xf32>
    %cst_7 = arith.constant dense<0.000000e+00> : vector<128xf32>
    %13 = vector.multi_reduction <add>, %12, %cst_7 [0] : vector<128x128xf32> to vector<128xf32>
    %14 = vector.shape_cast %13 : vector<128xf32> to vector<1x128xf32>
    %cst_8 = arith.constant 1.280000e+02 : f32
    %15 = vector.broadcast %cst_8 : f32 to vector<1x128xf32>
    %16 = arith.divf %14, %15 : vector<1x128xf32>
    %cst_9 = arith.constant 9.99999974E-6 : f32
    %17 = vector.broadcast %cst_9 : f32 to vector<1x128xf32>
    %18 = arith.addf %16, %17 : vector<1x128xf32>
    %19 = math.rsqrt %18 : vector<1x128xf32>
    %20 = vector.broadcast %19 : vector<1x128xf32> to vector<128x128xf32>
    %21 = arith.mulf %11, %20 : vector<128x128xf32>
    %c0_10 = arith.constant 0 : index
    %c0_11 = arith.constant 0 : index
    %22 = vector.load %arg4[%c0_10, %c0_11] : memref<1x128xf32, #tpu.memory_space<vmem>>, vector<1x128xf32>
    %23 = vector.broadcast %22 : vector<1x128xf32> to vector<128x128xf32>
    %24 = arith.mulf %21, %23 : vector<128x128xf32>
    %c0_12 = arith.constant 0 : index
    %c0_13 = arith.constant 0 : index
    %25 = vector.load %arg5[%c0_12, %c0_13] : memref<1x128xf32, #tpu.memory_space<vmem>>, vector<1x128xf32>
    %26 = vector.broadcast %25 : vector<1x128xf32> to vector<128x128xf32>
    %27 = arith.addf %24, %26 : vector<128x128xf32>
    %28 = arith.truncf %27 : vector<128x128xf32> to vector<128x128xbf16>
    %c0_14 = arith.constant 0 : index
    %c0_15 = arith.constant 0 : index
    %29 = vector.load %arg6[%c0_14, %c0_15] : memref<128x128xbf16, #tpu.memory_space<vmem>>, vector<128x128xbf16>
    tpu.vector_store %arg6[%c0_14, %c0_15], %28 {strides = array<i32>} : memref<128x128xbf16, #tpu.memory_space<vmem>>, vector<128x128xbf16>,
    return
  }
  func.func @transform_0(%arg0: i32) -> (i32, i32) {
    %c0_i32 = arith.constant 0 : i32
    %c0_i32_0 = arith.constant 0 : i32
    %c0_i32_1 = arith.constant 0 : i32
    return %c0_i32, %c0_i32_0 : i32, i32
  }
  func.func @transform_1(%arg0: i32) -> (i32, i32) {
    %c0_i32 = arith.constant 0 : i32
    %c0_i32_0 = arith.constant 0 : i32
    return %c0_i32, %arg0 : i32, i32
  }
  func.func @transform_2(%arg0: i32) -> (i32, i32) {
    %c0_i32 = arith.constant 0 : i32
    %c0_i32_0 = arith.constant 0 : i32
    return %c0_i32, %arg0 : i32, i32
  }
  func.func @transform_3(%arg0: i32) -> (i32, i32) {
    %c0_i32 = arith.constant 0 : i32
    %c0_i32_0 = arith.constant 0 : i32
    return %c0_i32, %arg0 : i32, i32
  }
  func.func @transform_4(%arg0: i32) -> (i32, i32) {
    %c0_i32 = arith.constant 0 : i32
    %c0_i32_0 = arith.constant 0 : i32
    return %c0_i32, %arg0 : i32, i32
  }
  func.func @transform_5(%arg0: i32) -> (i32, i32) {
    %c0_i32 = arith.constant 0 : i32
    %c0_i32_0 = arith.constant 0 : i32
    return %c0_i32, %arg0 : i32, i32
  }
}

module attributes {stable_mosaic.version = 11 : i64} {
  func.func @_linear_bn_act_kernel(%arg0: i32, %arg1: memref<128x256xbf16, #tpu.memory_space<vmem>>, %arg2: memref<256x128xbf16, #tpu.memory_space<vmem>>, %arg3: memref<1x128xf32, #tpu.memory_space<vmem>>, %arg4: memref<1x128xf32, #tpu.memory_space<vmem>>, %arg5: memref<1x128xf32, #tpu.memory_space<vmem>>, %arg6: memref<128x128xbf16, #tpu.memory_space<vmem>>) attributes {dimension_semantics = [#tpu.dimension_semantics<parallel>], iteration_bounds = array<i64: 2>, scalar_prefetch = 0 : i64, scratch_operands = 0 : i64, tpu.core_type = #tpu.core_type<tc>, window_params = [{pipeline_mode = #tpu.pipeline_mode<synchronous>, transform_indices = @transform_0, window_bounds = array<i64: 128, 256>}, {transform_indices = @transform_1, window_bounds = array<i64: 256, 128>}, {transform_indices = @transform_2, window_bounds = array<i64: 1, 128>}, {transform_indices = @transform_3, window_bounds = array<i64: 1, 128>}, {transform_indices = @transform_4, window_bounds = array<i64: 1, 128>}, {transform_indices = @transform_5, window_bounds = array<i64: 128, 128>}]} {
    %c0 = arith.constant 0 : index
    %c0_0 = arith.constant 0 : index
    %0 = vector.load %arg1[%c0, %c0_0] : memref<128x256xbf16, #tpu.memory_space<vmem>>, vector<128x256xbf16>
    %c0_1 = arith.constant 0 : index
    %c0_2 = arith.constant 0 : index
    %1 = vector.load %arg2[%c0_1, %c0_2] : memref<256x128xbf16, #tpu.memory_space<vmem>>, vector<256x128xbf16>
    %cst = arith.constant dense<0.000000e+00> : vector<128x128xf32>
    %2 = tpu.matmul %0, %1, %cst {dimension_numbers = #tpu.dot_dimension_numbers<[1], [0], [0], [1], [0, 0, 1, 1], [], []>} : vector<128x256xbf16>, vector<256x128xbf16>, vector<128x128xf32> -> vector<128x128xf32>
    %c0_3 = arith.constant 0 : index
    %c0_4 = arith.constant 0 : index
    %3 = vector.load %arg3[%c0_3, %c0_4] : memref<1x128xf32, #tpu.memory_space<vmem>>, vector<1x128xf32>
    %4 = vector.broadcast %3 : vector<1x128xf32> to vector<128x128xf32>
    %5 = arith.addf %2, %4 : vector<128x128xf32>
    %cst_5 = arith.constant dense<0.000000e+00> : vector<128xf32>
    %6 = vector.multi_reduction <add>, %5, %cst_5 [0] : vector<128x128xf32> to vector<128xf32>
    %7 = vector.shape_cast %6 : vector<128xf32> to vector<1x128xf32>
    %cst_6 = arith.constant 1.280000e+02 : f32
    %8 = vector.broadcast %cst_6 : f32 to vector<1x128xf32>
    %9 = arith.divf %7, %8 : vector<1x128xf32>
    %10 = vector.broadcast %9 : vector<1x128xf32> to vector<128x128xf32>
    %11 = arith.subf %5, %10 : vector<128x128xf32>
    %12 = arith.mulf %11, %11 : vector<128x128xf32>
    %cst_7 = arith.constant dense<0.000000e+00> : vector<128xf32>
    %13 = vector.multi_reduction <add>, %12, %cst_7 [0] : vector<128x128xf32> to vector<128xf32>
    %14 = vector.shape_cast %13 : vector<128xf32> to vector<1x128xf32>
    %cst_8 = arith.constant 1.280000e+02 : f32
    %15 = vector.broadcast %cst_8 : f32 to vector<1x128xf32>
    %16 = arith.divf %14, %15 : vector<1x128xf32>
    %cst_9 = arith.constant 9.99999974E-6 : f32
    %17 = vector.broadcast %cst_9 : f32 to vector<1x128xf32>
    %18 = arith.addf %16, %17 : vector<1x128xf32>
    %19 = math.rsqrt %18 : vector<1x128xf32>
    %20 = vector.broadcast %19 : vector<1x128xf32> to vector<128x128xf32>
    %21 = arith.mulf %11, %20 : vector<128x128xf32>
    %c0_10 = arith.constant 0 : index
    %c0_11 = arith.constant 0 : index
    %22 = vector.load %arg4[%c0_10, %c0_11] : memref<1x128xf32, #tpu.memory_space<vmem>>, vector<1x128xf32>
    %23 = vector.broadcast %22 : vector<1x128xf32> to vector<128x128xf32>
    %24 = arith.mulf %21, %23 : vector<128x128xf32>
    %c0_12 = arith.constant 0 : index
    %c0_13 = arith.constant 0 : index
    %25 = vector.load %arg5[%c0_12, %c0_13] : memref<1x128xf32, #tpu.memory_space<vmem>>, vector<1x128xf32>
    %26 = vector.broadcast %25 : vector<1x128xf32> to vector<128x128xf32>
    %27 = arith.addf %24, %26 : vector<128x128xf32>
    %cst_14 = arith.constant 0.000000e+00 : f32
    %28 = vector.broadcast %cst_14 : f32 to vector<128x128xf32>
    %29 = arith.cmpf oge, %27, %28 : vector<128x128xf32>
    %cst_15 = arith.constant 0.00999999977 : f32
    %30 = vector.broadcast %cst_15 : f32 to vector<128x128xf32>
    %31 = arith.mulf %30, %27 : vector<128x128xf32>
    %32 = arith.select %29, %27, %31 : vector<128x128xi1>, vector<128x128xf32>
    %33 = arith.truncf %32 : vector<128x128xf32> to vector<128x128xbf16>
    %c0_16 = arith.constant 0 : index
    %c0_17 = arith.constant 0 : index
    %34 = vector.load %arg6[%c0_16, %c0_17] : memref<128x128xbf16, #tpu.memory_space<vmem>>, vector<128x128xbf16>
    tpu.vector_store %arg6[%c0_16, %c0_17], %33 {strides = array<i32>} : memref<128x128xbf16, #tpu.memory_space<vmem>>, vector<128x128xbf16>,
    return
  }
  func.func @transform_0(%arg0: i32) -> (i32, i32) {
    %c0_i32 = arith.constant 0 : i32
    %c0_i32_0 = arith.constant 0 : i32
    %c0_i32_1 = arith.constant 0 : i32
    return %c0_i32, %c0_i32_0 : i32, i32
  }
  func.func @transform_1(%arg0: i32) -> (i32, i32) {
    %c0_i32 = arith.constant 0 : i32
    %c0_i32_0 = arith.constant 0 : i32
    return %c0_i32, %arg0 : i32, i32
  }
  func.func @transform_2(%arg0: i32) -> (i32, i32) {
    %c0_i32 = arith.constant 0 : i32
    %c0_i32_0 = arith.constant 0 : i32
    return %c0_i32, %arg0 : i32, i32
  }
  func.func @transform_3(%arg0: i32) -> (i32, i32) {
    %c0_i32 = arith.constant 0 : i32
    %c0_i32_0 = arith.constant 0 : i32
    return %c0_i32, %arg0 : i32, i32
  }
  func.func @transform_4(%arg0: i32) -> (i32, i32) {
    %c0_i32 = arith.constant 0 : i32
    %c0_i32_0 = arith.constant 0 : i32
    return %c0_i32, %arg0 : i32, i32
  }
  func.func @transform_5(%arg0: i32) -> (i32, i32) {
    %c0_i32 = arith.constant 0 : i32
    %c0_i32_0 = arith.constant 0 : i32
    return %c0_i32, %arg0 : i32, i32
  }
}

module attributes {stable_mosaic.version = 11 : i64} {
  func.func @_linear_kernel(%arg0: i32, %arg1: memref<128x128xbf16, #tpu.memory_space<vmem>>, %arg2: memref<128x128xbf16, #tpu.memory_space<vmem>>, %arg3: memref<1x128xf32, #tpu.memory_space<vmem>>, %arg4: memref<128x128xf32, #tpu.memory_space<vmem>>) attributes {dimension_semantics = [#tpu.dimension_semantics<parallel>], iteration_bounds = array<i64: 1>, scalar_prefetch = 0 : i64, scratch_operands = 0 : i64, tpu.core_type = #tpu.core_type<tc>, window_params = [{pipeline_mode = #tpu.pipeline_mode<synchronous>, transform_indices = @transform_0, window_bounds = array<i64: 128, 128>}, {transform_indices = @transform_1, window_bounds = array<i64: 128, 128>}, {transform_indices = @transform_2, window_bounds = array<i64: 1, 128>}, {transform_indices = @transform_3, window_bounds = array<i64: 128, 128>}]} {
    %c0 = arith.constant 0 : index
    %c0_0 = arith.constant 0 : index
    %0 = vector.load %arg1[%c0, %c0_0] : memref<128x128xbf16, #tpu.memory_space<vmem>>, vector<128x128xbf16>
    %c0_1 = arith.constant 0 : index
    %c0_2 = arith.constant 0 : index
    %1 = vector.load %arg2[%c0_1, %c0_2] : memref<128x128xbf16, #tpu.memory_space<vmem>>, vector<128x128xbf16>
    %cst = arith.constant dense<0.000000e+00> : vector<128x128xf32>
    %2 = tpu.matmul %0, %1, %cst {dimension_numbers = #tpu.dot_dimension_numbers<[1], [0], [0], [1], [0, 0, 1, 1], [], []>} : vector<128x128xbf16>, vector<128x128xbf16>, vector<128x128xf32> -> vector<128x128xf32>
    %c0_3 = arith.constant 0 : index
    %c0_4 = arith.constant 0 : index
    %3 = vector.load %arg3[%c0_3, %c0_4] : memref<1x128xf32, #tpu.memory_space<vmem>>, vector<1x128xf32>
    %4 = vector.broadcast %3 : vector<1x128xf32> to vector<128x128xf32>
    %5 = arith.addf %2, %4 : vector<128x128xf32>
    %c0_5 = arith.constant 0 : index
    %c0_6 = arith.constant 0 : index
    %6 = vector.load %arg4[%c0_5, %c0_6] : memref<128x128xf32, #tpu.memory_space<vmem>>, vector<128x128xf32>
    tpu.vector_store %arg4[%c0_5, %c0_6], %5 {strides = array<i32>} : memref<128x128xf32, #tpu.memory_space<vmem>>, vector<128x128xf32>,
    return
  }
  func.func @transform_0(%arg0: i32) -> (i32, i32) {
    %c0_i32 = arith.constant 0 : i32
    %c0_i32_0 = arith.constant 0 : i32
    %c0_i32_1 = arith.constant 0 : i32
    return %c0_i32, %c0_i32_0 : i32, i32
  }
  func.func @transform_1(%arg0: i32) -> (i32, i32) {
    %c0_i32 = arith.constant 0 : i32
    %c0_i32_0 = arith.constant 0 : i32
    return %c0_i32, %arg0 : i32, i32
  }
  func.func @transform_2(%arg0: i32) -> (i32, i32) {
    %c0_i32 = arith.constant 0 : i32
    %c0_i32_0 = arith.constant 0 : i32
    return %c0_i32, %arg0 : i32, i32
  }
  func.func @transform_3(%arg0: i32) -> (i32, i32) {
    %c0_i32 = arith.constant 0 : i32
    %c0_i32_0 = arith.constant 0 : i32
    return %c0_i32, %arg0 : i32, i32
  }
}

</mosaic_0001>

<bundles_post_ra>
// kernel: shap_autoencoder2_forward.6
= control target key start
LH: loop header
LB: loop body
LE: loop exit
PB: predicated region body
PF: predicated region fallthrough
CT: control target
= control target key end

     0   :  { %s478_s1 = inlined_call_operand.vmem [shape: bf16[128,128], index: 1, kind: input, shape index: {}]   ;;  %s479_s2 = inlined_call_operand.vmem [shape: f32[1,128], index: 2, kind: input, shape index: {}]   ;;  %s480_s0 = inlined_call_operand.vmem [shape: bf16[128,128], index: 0, kind: input, shape index: {}]   ;;  %s481_s3 = inlined_call_operand.vmem [shape: bf16[128,128], index: 3, kind: output, shape index: {}]  }
   0x1   :  { %v310_v0 = vld [vmem:[%s478_s1 + $0x38] sm:$0xff]  ;;  %v309_v1 = vld [vmem:[%s478_s1 + $0x30] sm:$0xff]  ;;  %v308_v2 = vld [vmem:[%s478_s1 + $0x28] sm:$0xff] }
   0x2   :  { %146 = vmatpush.bf16.msra.mxu0 %v310_v0  ;;  %358 = vmatpush.bf16.msra.mxu1 %v310_v0  ;;  %v307_v3 = vld [vmem:[%s478_s1 + $0x20] sm:$0xff]  ;;  %v306_v4 = vld [vmem:[%s478_s1 + $0x18] sm:$0xff]  ;;  %v305_v5 = vld [vmem:[%s478_s1 + $0x10] sm:$0xff] }
   0x3   :  { %359 = vmatpush.bf16.msra.mxu2 %v310_v0  ;;  %360 = vmatpush.bf16.msra.mxu3 %v310_v0  ;;  %v304_v6 = vld [vmem:[%s478_s1 + $0x8] sm:$0xff]  ;;  %v303_v7 = vld [vmem:[%s478_s1] sm:$0xff]  ;;  %v297_v9 = vld [vmem:[%s480_s0 + $0x10] sm:$0xff] }
   0x4   :  { %v295_v8 = vld [vmem:[%s480_s0] sm:$0xff]  ;;  %v301_v11 = vld [vmem:[%s480_s0 + $0x30] sm:$0xff]  ;;  %v296_v12 = vld [vmem:[%s480_s0 + $0x8] sm:$0xff] }
   0x5   :  { %v299_v10 = vld [vmem:[%s480_s0 + $0x20] sm:$0xff]  ;;  %v298_v13 = vld [vmem:[%s480_s0 + $0x18] sm:$0xff]  ;;  %v300_v14 = vld [vmem:[%s480_s0 + $0x28] sm:$0xff] }
   0x6   :  { %147 = vmatpush.bf16.msra.mxu0 %v309_v1  ;;  %361 = vmatpush.bf16.msra.mxu1 %v309_v1  ;;  %v302_v15 = vld [vmem:[%s480_s0 + $0x38] sm:$0xff]  ;;  %v382_v18 = vld [vmem:[%s479_s2] ss:$0 sm:$0xff] }
   0x7   :  { %362 = vmatpush.bf16.msra.mxu2 %v309_v1  ;;  %363 = vmatpush.bf16.msra.mxu3 %v309_v1 }
   0xa   :  { %148 = vmatpush.bf16.msra.mxu0 %v308_v2  ;;  %364 = vmatpush.bf16.msra.mxu1 %v308_v2 }
   0xb   :  { %365 = vmatpush.bf16.msra.mxu2 %v308_v2  ;;  %366 = vmatpush.bf16.msra.mxu3 %v308_v2 }
   0xe   :  { %149 = vmatpush.bf16.msra.mxu0 %v307_v3  ;;  %367 = vmatpush.bf16.msra.mxu1 %v307_v3 }
   0xf   :  { %368 = vmatpush.bf16.msra.mxu2 %v307_v3  ;;  %369 = vmatpush.bf16.msra.mxu3 %v307_v3 }
  0x12   :  { %150 = vmatpush.bf16.msra.mxu0 %v306_v4  ;;  %370 = vmatpush.bf16.msra.mxu1 %v306_v4 }
  0x13   :  { %371 = vmatpush.bf16.msra.mxu2 %v306_v4  ;;  %372 = vmatpush.bf16.msra.mxu3 %v306_v4 }
  0x16   :  { %151 = vmatpush.bf16.msra.mxu0 %v305_v5  ;;  %373 = vmatpush.bf16.msra.mxu1 %v305_v5 }
  0x17   :  { %374 = vmatpush.bf16.msra.mxu2 %v305_v5  ;;  %375 = vmatpush.bf16.msra.mxu3 %v305_v5 }
  0x1a   :  { %152 = vmatpush.bf16.msra.mxu0 %v304_v6  ;;  %376 = vmatpush.bf16.msra.mxu1 %v304_v6 }
  0x1b   :  { %377 = vmatpush.bf16.msra.mxu2 %v304_v6  ;;  %378 = vmatpush.bf16.msra.mxu3 %v304_v6 }
  0x1e   :  { %153 = vmatpush.bf16.msra.mxu0 %v303_v7  ;;  %379 = vmatpush.bf16.msra.mxu1 %v303_v7 }
  0x1f   :  { %380 = vmatpush.bf16.msra.mxu2 %v303_v7  ;;  %381 = vmatpush.bf16.msra.mxu3 %v303_v7 }
  0x21   :  { %154 = vmatmul.bf16.vlgmr.msra.gmra.mxu0 %v295_v8  ;;  %164 = vmatmul.bf16.vlgmr.msra.gmra.mxu1 %v297_v9 }
  0x22   :  { %174 = vmatmul.bf16.vlgmr.msra.gmra.mxu2 %v299_v10  ;;  %184 = vmatmul.bf16.vlgmr.msra.gmra.mxu3 %v301_v11 }
  0x31   :  { %159 = vmatmul.bf16.gmra.mxu0 %v296_v12  ;;  %169 = vmatmul.bf16.gmra.mxu1 %v298_v13 }
  0x32   :  { %179 = vmatmul.bf16.gmra.mxu2 %v300_v14  ;;  %189 = vmatmul.bf16.gmra.mxu3 %v302_v15 }
  0x9e   :  { %v155_v16 = vpop.f32.mrf.mxu0  ;;  %v165_v17 = vpop.f32.mrf.mxu1 }
  0x9f   :  { %v156_v23 = vadd.f32 %v382_v18, %v155_v16  ;;  %v166_v24 = vadd.f32 %v382_v18, %v165_v17 }
  0xa5   :  { %v175_v19 = vpop.f32.mrf.mxu2  ;;  %v185_v20 = vpop.f32.mrf.mxu3 }
  0xa6   :  { %v157_v21 = vpop.f32.mrf.mxu0  ;;  %v167_v22 = vpop.f32.mrf.mxu1  ;;  %v176_v31 = vadd.f32 %v382_v18, %v175_v19  ;;  %v186_v32 = vadd.f32 %v382_v18, %v185_v20 }
  0xa7   :  { %v158_v25 = vadd.f32 %v382_v18, %v157_v21  ;;  %v168_v26 = vadd.f32 %v382_v18, %v167_v22 }
  0xa9   :  { %v314_v27 = vpack.c.bf16 %v158_v25, %v156_v23  ;;  %v324_v28 = vpack.c.bf16 %v168_v26, %v166_v24 }
  0xab   :  { %315 = vst [vmem:[%s481_s3] sm:$0xff] %v314_v27  }
  0xac   :  { %352 = vst [vmem:[%s481_s3 + $0x10] sm:$0xff] %v324_v28  }
  0xad   :  { %v177_v29 = vpop.f32.mrf.mxu2  ;;  %v187_v30 = vpop.f32.mrf.mxu3 }
  0xae   :  { %v178_v33 = vadd.f32 %v382_v18, %v177_v29  ;;  %v188_v34 = vadd.f32 %v382_v18, %v187_v30  ;;  %v160_v35 = vpop.f32.mrf.mxu0  ;;  %v170_v36 = vpop.f32.mrf.mxu1 }
  0xaf   :  { %v161_v43 = vadd.f32 %v382_v18, %v160_v35  ;;  %v171_v44 = vadd.f32 %v382_v18, %v170_v36 }
  0xb0   :  { %v334_v37 = vpack.c.bf16 %v178_v33, %v176_v31  ;;  %v344_v38 = vpack.c.bf16 %v188_v34, %v186_v32 }
  0xb2   :  { %354 = vst [vmem:[%s481_s3 + $0x20] sm:$0xff] %v334_v37  }
  0xb3   :  { %356 = vst [vmem:[%s481_s3 + $0x30] sm:$0xff] %v344_v38  }
  0xb5   :  { %v180_v39 = vpop.f32.mrf.mxu2  ;;  %v190_v40 = vpop.f32.mrf.mxu3 }
  0xb6   :  { %v162_v41 = vpop.f32.mrf.mxu0  ;;  %v172_v42 = vpop.f32.mrf.mxu1  ;;  %v181_v51 = vadd.f32 %v382_v18, %v180_v39  ;;  %v191_v52 = vadd.f32 %v382_v18, %v190_v40 }
  0xb7   :  { %v163_v45 = vadd.f32 %v382_v18, %v162_v41  ;;  %v173_v46 = vadd.f32 %v382_v18, %v172_v42 }
  0xb9   :  { %v319_v47 = vpack.c.bf16 %v163_v45, %v161_v43  ;;  %v329_v48 = vpack.c.bf16 %v173_v46, %v171_v44 }
  0xbb   :  { %351 = vst [vmem:[%s481_s3 + $0x8] sm:$0xff] %v319_v47  }
  0xbc   :  { %353 = vst [vmem:[%s481_s3 + $0x18] sm:$0xff] %v329_v48  }
  0xbd   :  { %v182_v49 = vpop.f32.mrf.mxu2  ;;  %v192_v50 = vpop.f32.mrf.mxu3 }
  0xbe   :  { %v183_v53 = vadd.f32 %v382_v18, %v182_v49  ;;  %v193_v54 = vadd.f32 %v382_v18, %v192_v50 }
  0xc0   :  { %v339_v55 = vpack.c.bf16 %v183_v53, %v181_v51  ;;  %v349_v56 = vpack.c.bf16 %v193_v54, %v191_v52 }
  0xc2   :  { %355 = vst [vmem:[%s481_s3 + $0x28] sm:$0xff] %v339_v55  }
  0xc3   :  { %357 = vst [vmem:[%s481_s3 + $0x38] sm:$0xff] %v349_v56  }

// kernel: shap_autoencoder2_forward.5
= control target key start
LH: loop header
LB: loop body
LE: loop exit
PB: predicated region body
PF: predicated region fallthrough
CT: control target
= control target key end

     0   :  { %s1029_s1 = inlined_call_operand.vmem [shape: bf16[256,128], index: 1, kind: input, shape index: {}]   ;;  %s1030_s2 = inlined_call_operand.vmem [shape: f32[1,128], index: 2, kind: input, shape index: {}]   ;;  %s1031_s0 = inlined_call_operand.vmem [shape: bf16[128,256], index: 0, kind: input, shape index: {}]   ;;  %s1032_s3 = inlined_call_operand.vmem [shape: f32[1,128], index: 3, kind: input, shape index: {}]   ;;  %s1033_s4 = inlined_call_operand.vmem [shape: f32[1,128], index: 4, kind: input, shape index: {}]   ;;  %s1034_s5 = inlined_call_operand.vmem [shape: bf16[128,128], index: 5, kind: output, shape index: {}]  }
   0x1   :  { %v683_v0 = vld [vmem:[%s1029_s1 + $0x38] sm:$0xff]  ;;  %v682_v2 = vld [vmem:[%s1029_s1 + $0x30] sm:$0xff]  ;;  %v681_v4 = vld [vmem:[%s1029_s1 + $0x28] sm:$0xff] }
   0x2   :  { %v691_v1 = vld [vmem:[%s1029_s1 + $0x78] sm:$0xff]  ;;  %248 = vmatpush.bf16.msra.mxu0 %v683_v0  ;;  %v690_v3 = vld [vmem:[%s1029_s1 + $0x70] sm:$0xff]  ;;  %739 = vmatpush.bf16.msra.mxu2 %v683_v0  ;;  %v689_v5 = vld [vmem:[%s1029_s1 + $0x68] sm:$0xff] }
   0x3   :  { %297 = vmatpush.bf16.msra.mxu1 %v691_v1  ;;  %747 = vmatpush.bf16.msra.mxu3 %v691_v1  ;;  %v680_v6 = vld [vmem:[%s1029_s1 + $0x20] sm:$0xff]  ;;  %v679_v8 = vld [vmem:[%s1029_s1 + $0x18] sm:$0xff]  ;;  %v678_v10 = vld [vmem:[%s1029_s1 + $0x10] sm:$0xff] }
   0x4   :  { %v688_v7 = vld [vmem:[%s1029_s1 + $0x60] sm:$0xff]  ;;  %v687_v9 = vld [vmem:[%s1029_s1 + $0x58] sm:$0xff]  ;;  %v686_v11 = vld [vmem:[%s1029_s1 + $0x50] sm:$0xff] }
   0x5   :  { %v677_v12 = vld [vmem:[%s1029_s1 + $0x8] sm:$0xff]  ;;  %v676_v14 = vld [vmem:[%s1029_s1] sm:$0xff]  ;;  %v542_v28 = vld [vmem:[%s1031_s0 + $0x10] sm:$0xf] }
   0x6   :  { %249 = vmatpush.bf16.msra.mxu0 %v682_v2  ;;  %740 = vmatpush.bf16.msra.mxu2 %v682_v2  ;;  %v685_v13 = vld [vmem:[%s1029_s1 + $0x48] sm:$0xff]  ;;  %v684_v15 = vld [vmem:[%s1029_s1 + $0x40] sm:$0xff]  ;;  %v663_v29 = vld [vmem:[%s1031_s0 + $0x14] sm:$0xf0] }
   0x7   :  { %298 = vmatpush.bf16.msra.mxu1 %v690_v3  ;;  %748 = vmatpush.bf16.msra.mxu3 %v690_v3  ;;  %v534_v16 = vld [vmem:[%s1031_s0] sm:$0xf]  ;;  %v661_v17 = vld [vmem:[%s1031_s0 + $0x4] sm:$0xf0]  ;;  %v660_v18 = vld [vmem:[%s1031_s0 + $0x4] sm:$0xf]  ;;  %v543_v36 = vor.u32 %v663_v29, %v542_v28 }
   0x8   :  { %v536_v19 = vld [vmem:[%s1031_s0 + $0x8] sm:$0xf0]  ;;  %v566_v20 = vld [vmem:[%s1031_s0 + $0x40] sm:$0xf]  ;;  %v669_v21 = vld [vmem:[%s1031_s0 + $0x44] sm:$0xf0]  ;;  %v535_v24 = vor.u32 %v661_v17, %v534_v16 }
   0x9   :  { %v668_v22 = vld [vmem:[%s1031_s0 + $0x44] sm:$0xf]  ;;  %v568_v23 = vld [vmem:[%s1031_s0 + $0x48] sm:$0xf0]  ;;  %v539_v25 = vor.u32 %v660_v18, %v536_v19  ;;  %v567_v26 = vor.u32 %v669_v21, %v566_v20  ;;  %v662_v30 = vld [vmem:[%s1031_s0 + $0x14] sm:$0xf] }
   0xa   :  { %250 = vmatpush.bf16.msra.mxu0 %v681_v4  ;;  %741 = vmatpush.bf16.msra.mxu2 %v681_v4  ;;  %v571_v27 = vor.u32 %v668_v22, %v568_v23  ;;  %v544_v31 = vld [vmem:[%s1031_s0 + $0x18] sm:$0xf0]  ;;  %v574_v32 = vld [vmem:[%s1031_s0 + $0x50] sm:$0xf]  ;;  %v671_v33 = vld [vmem:[%s1031_s0 + $0x54] sm:$0xf0] }
   0xb   :  { %299 = vmatpush.bf16.msra.mxu1 %v689_v5  ;;  %749 = vmatpush.bf16.msra.mxu3 %v689_v5  ;;  %v670_v34 = vld [vmem:[%s1031_s0 + $0x54] sm:$0xf]  ;;  %v576_v35 = vld [vmem:[%s1031_s0 + $0x58] sm:$0xf0]  ;;  %v547_v37 = vor.u32 %v662_v30, %v544_v31  ;;  %v575_v38 = vor.u32 %v671_v33, %v574_v32  ;;  %v550_v40 = vld [vmem:[%s1031_s0 + $0x20] sm:$0xf] }
   0xc   :  { %v579_v39 = vor.u32 %v670_v34, %v576_v35  ;;  %v665_v41 = vld [vmem:[%s1031_s0 + $0x24] sm:$0xf0]  ;;  %v664_v42 = vld [vmem:[%s1031_s0 + $0x24] sm:$0xf]  ;;  %v552_v43 = vld [vmem:[%s1031_s0 + $0x28] sm:$0xf0] }
   0xd   :  { %v582_v44 = vld [vmem:[%s1031_s0 + $0x60] sm:$0xf]  ;;  %v673_v45 = vld [vmem:[%s1031_s0 + $0x64] sm:$0xf0]  ;;  %v672_v46 = vld [vmem:[%s1031_s0 + $0x64] sm:$0xf]  ;;  %v551_v48 = vor.u32 %v665_v41, %v550_v40  ;;  %v555_v49 = vor.u32 %v664_v42, %v552_v43 }
   0xe   :  { %251 = vmatpush.bf16.msra.mxu0 %v680_v6  ;;  %742 = vmatpush.bf16.msra.mxu2 %v680_v6  ;;  %v584_v47 = vld [vmem:[%s1031_s0 + $0x68] sm:$0xf0]  ;;  %v583_v50 = vor.u32 %v673_v45, %v582_v44  ;;  %v558_v52 = vld [vmem:[%s1031_s0 + $0x30] sm:$0xf]  ;;  %v667_v53 = vld [vmem:[%s1031_s0 + $0x34] sm:$0xf0] }
   0xf   :  { %300 = vmatpush.bf16.msra.mxu1 %v688_v7  ;;  %750 = vmatpush.bf16.msra.mxu3 %v688_v7  ;;  %v587_v51 = vor.u32 %v672_v46, %v584_v47  ;;  %v666_v54 = vld [vmem:[%s1031_s0 + $0x34] sm:$0xf]  ;;  %v560_v55 = vld [vmem:[%s1031_s0 + $0x38] sm:$0xf0]  ;;  %v590_v56 = vld [vmem:[%s1031_s0 + $0x70] sm:$0xf]  ;;  %v559_v60 = vor.u32 %v667_v53, %v558_v52 }
  0x10   :  { %v675_v57 = vld [vmem:[%s1031_s0 + $0x74] sm:$0xf0]  ;;  %v674_v58 = vld [vmem:[%s1031_s0 + $0x74] sm:$0xf]  ;;  %v592_v59 = vld [vmem:[%s1031_s0 + $0x78] sm:$0xf0]  ;;  %v563_v61 = vor.u32 %v666_v54, %v560_v55 }
  0x11   :  { %v591_v62 = vor.u32 %v675_v57, %v590_v56  ;;  %v595_v63 = vor.u32 %v674_v58, %v592_v59  ;;  %v756_v18 = vld [vmem:[%s1030_s2] ss:$0 sm:$0xff] }
  0x12   :  { %252 = vmatpush.bf16.msra.mxu0 %v679_v8  ;;  %743 = vmatpush.bf16.msra.mxu2 %v679_v8 }
  0x13   :  { %301 = vmatpush.bf16.msra.mxu1 %v687_v9  ;;  %751 = vmatpush.bf16.msra.mxu3 %v687_v9 }
  0x16   :  { %253 = vmatpush.bf16.msra.mxu0 %v678_v10  ;;  %744 = vmatpush.bf16.msra.mxu2 %v678_v10 }
  0x17   :  { %302 = vmatpush.bf16.msra.mxu1 %v686_v11  ;;  %752 = vmatpush.bf16.msra.mxu3 %v686_v11 }
  0x1a   :  { %254 = vmatpush.bf16.msra.mxu0 %v677_v12  ;;  %745 = vmatpush.bf16.msra.mxu2 %v677_v12 }
  0x1b   :  { %303 = vmatpush.bf16.msra.mxu1 %v685_v13  ;;  %753 = vmatpush.bf16.msra.mxu3 %v685_v13 }
  0x1e   :  { %255 = vmatpush.bf16.msra.mxu0 %v676_v14  ;;  %746 = vmatpush.bf16.msra.mxu2 %v676_v14 }
  0x1f   :  { %304 = vmatpush.bf16.msra.mxu1 %v684_v15  ;;  %754 = vmatpush.bf16.msra.mxu3 %v684_v15 }
  0x21   :  { %256 = vmatmul.bf16.vlgmr.msra.gmra.mxu0 %v535_v24  ;;  %276 = vmatmul.bf16.vlgmr.msra.gmra.mxu2 %v567_v26 }
  0x22   :  { %305 = vmatmul.bf16.vlgmr.msra.gmra.mxu1 %v539_v25  ;;  %325 = vmatmul.bf16.vlgmr.msra.gmra.mxu3 %v571_v27 }
  0x31   :  { %261 = vmatmul.bf16.gmra.mxu0 %v543_v36  ;;  %281 = vmatmul.bf16.gmra.mxu2 %v575_v38 }
  0x32   :  { %310 = vmatmul.bf16.gmra.mxu1 %v547_v37  ;;  %330 = vmatmul.bf16.gmra.mxu3 %v579_v39 }
  0x41   :  { %266 = vmatmul.bf16.gmra.mxu0 %v551_v48  ;;  %286 = vmatmul.bf16.gmra.mxu2 %v583_v50 }
  0x42   :  { %315 = vmatmul.bf16.gmra.mxu1 %v555_v49  ;;  %335 = vmatmul.bf16.gmra.mxu3 %v587_v51 }
  0x51   :  { %271 = vmatmul.bf16.gmra.mxu0 %v559_v60  ;;  %291 = vmatmul.bf16.gmra.mxu2 %v591_v62 }
  0x52   :  { %320 = vmatmul.bf16.gmra.mxu1 %v563_v61  ;;  %340 = vmatmul.bf16.gmra.mxu3 %v595_v63  ;;  %v763_v61 = vmov 128.0  }
  0x53   :  { %759 = vrcp.f32 %v763_v61 }
  0x9e   :  { %v257_v0 = vpop.f32.mrf.mxu0 }
  0x9f   :  { %v306_v1 = vpop.f32.mrf.mxu1  ;;  %v258_v24 = vadd.f32 %v756_v18, %v257_v0 }
  0xa1   :  { %v943_v28 = vadd.f32 %v306_v1, %v258_v24 }
  0xa4   :  { %v277_v2 = vpop.f32.mrf.mxu2 }
  0xa5   :  { %v326_v3 = vpop.f32.mrf.mxu3  ;;  %v278_v46 = vadd.f32 %v756_v18, %v277_v2 }
  0xa6   :  { %v259_v4 = vpop.f32.mrf.mxu0 }
  0xa7   :  { %v308_v5 = vpop.f32.mrf.mxu1  ;;  %v260_v22 = vadd.f32 %v756_v18, %v259_v4  ;;  %v327_v54 = vadd.f32 %v326_v3, %v278_v46 }
  0xa9   :  { %v941_v26 = vadd.f32 %v308_v5, %v260_v22 }
  0xab   :  { %v346_v34 = vadd.f32 %v941_v26, %v943_v28 }
  0xac   :  { %v279_v6 = vpop.f32.mrf.mxu2 }
  0xad   :  { %v328_v7 = vpop.f32.mrf.mxu3  ;;  %v280_v51 = vadd.f32 %v756_v18, %v279_v6  ;;  %v760_v6 = vpop.eup %759 }
  0xae   :  { %v262_v8 = vpop.f32.mrf.mxu0  ;;  %vm372_vm0 = vweird.f32 %v760_v6 }
  0xaf   :  { %v311_v9 = vpop.f32.mrf.mxu1  ;;  %v263_v25 = vadd.f32 %v756_v18, %v262_v8  ;;  %v329_v58 = vadd.f32 %v328_v7, %v280_v51  ;;  %v368_v7 = vmul.f32 128.0, %v760_v6 }
  0xb1   :  { %v945_v29 = vadd.f32 %v311_v9, %v263_v25 }
  0xb3   :  { %v347_v37 = vadd.f32 %v346_v34, %v945_v29 }
  0xb4   :  { %v282_v10 = vpop.f32.mrf.mxu2 }
  0xb5   :  { %v331_v11 = vpop.f32.mrf.mxu3  ;;  %v283_v55 = vadd.f32 %v756_v18, %v282_v10 }
  0xb6   :  { %v264_v12 = vpop.f32.mrf.mxu0 }
  0xb7   :  { %v313_v13 = vpop.f32.mrf.mxu1  ;;  %v265_v27 = vadd.f32 %v756_v18, %v264_v12  ;;  %v332_v62 = vadd.f32 %v331_v11, %v283_v55  ;;  %v369_v11 = vsub.f32 1.0, %v368_v7 }
  0xb9   :  { %v949_v35 = vadd.f32 %v313_v13, %v265_v27 }
  0xbb   :  { %v348_v41 = vadd.f32 %v347_v37, %v949_v35 }
  0xbc   :  { %v284_v14 = vpop.f32.mrf.mxu2 }
  0xbd   :  { %v333_v15 = vpop.f32.mrf.mxu3  ;;  %v285_v59 = vadd.f32 %v756_v18, %v284_v14 }
  0xbe   :  { %v267_v16 = vpop.f32.mrf.mxu0 }
  0xbf   :  { %v316_v17 = vpop.f32.mrf.mxu1  ;;  %v268_v30 = vadd.f32 %v756_v18, %v267_v16  ;;  %v334_v1 = vadd.f32 %v333_v15, %v285_v59  ;;  %v370_v15 = vmul.f32 %v760_v6, %v369_v11 }
  0xc1   :  { %v952_v38 = vadd.f32 %v316_v17, %v268_v30  ;;  %v371_v27 = vadd.f32 %v760_v6, %v370_v15 }
  0xc3   :  { %v349_v43 = vadd.f32 %v348_v41, %v952_v38 }
  0xc4   :  { %v287_v19 = vpop.f32.mrf.mxu2 }
  0xc5   :  { %v336_v23 = vpop.f32.mrf.mxu3  ;;  %v288_v63 = vadd.f32 %v756_v18, %v287_v19 }
  0xc6   :  { %v269_v20 = vpop.f32.mrf.mxu0 }
  0xc7   :  { %v318_v21 = vpop.f32.mrf.mxu1  ;;  %v270_v36 = vadd.f32 %v756_v18, %v269_v20  ;;  %v337_v8 = vadd.f32 %v336_v23, %v288_v63 }
  0xc9   :  { %v955_v42 = vadd.f32 %v318_v21, %v270_v36 }
  0xcb   :  { %v350_v47 = vadd.f32 %v349_v43, %v955_v42 }
  0xcc   :  { %v289_v31 = vpop.f32.mrf.mxu2 }
  0xcd   :  { %v338_v40 = vpop.f32.mrf.mxu3  ;;  %v290_v2 = vadd.f32 %v756_v18, %v289_v31  ;;  %v373_v31 = vsel %vm372_vm0, %v760_v6, %v371_v27 }
  0xce   :  { %v272_v32 = vpop.f32.mrf.mxu0 }
  0xcf   :  { %v321_v33 = vpop.f32.mrf.mxu1  ;;  %v273_v39 = vadd.f32 %v756_v18, %v272_v32  ;;  %v339_v3 = vadd.f32 %v338_v40, %v290_v2 }
  0xd1   :  { %v958_v44 = vadd.f32 %v321_v33, %v273_v39 }
  0xd3   :  { %v351_v52 = vadd.f32 %v350_v47, %v958_v44 }
  0xd4   :  { %v292_v49 = vpop.f32.mrf.mxu2 }
  0xd5   :  { %v341_v57 = vpop.f32.mrf.mxu3  ;;  %v293_v9 = vadd.f32 %v756_v18, %v292_v49 }
  0xd6   :  { %v274_v45 = vpop.f32.mrf.mxu0 }
  0xd7   :  { %v275_v48 = vadd.f32 %v756_v18, %v274_v45  ;;  %v323_v50 = vpop.f32.mrf.mxu1  ;;  %v342_v14 = vadd.f32 %v341_v57, %v293_v9 }
  0xd9   :  { %v324_v53 = vadd.f32 %v323_v50, %v275_v48 }
  0xdb   :  { %v352_v56 = vadd.f32 %v351_v52, %v324_v53 }
  0xdc   :  { %v294_v5 = vpop.f32.mrf.mxu2 }
  0xdd   :  { %v353_v60 = vadd.f32 %v352_v56, %v327_v54  ;;  %v295_v13 = vadd.f32 %v756_v18, %v294_v5  ;;  %v343_v16 = vpop.f32.mrf.mxu3 }
  0xdf   :  { %v354_v0 = vadd.f32 %v353_v60, %v329_v58  ;;  %v344_v21 = vadd.f32 %v343_v16, %v295_v13 }
  0xe1   :  { %v355_v4 = vadd.f32 %v354_v0, %v332_v62 }
  0xe3   :  { %v356_v12 = vadd.f32 %v355_v4, %v334_v1 }
  0xe5   :  { %v357_v10 = vadd.f32 %v356_v12, %v337_v8 }
  0xe7   :  { %v358_v17 = vadd.f32 %v357_v10, %v339_v3 }
  0xe9   :  { %v359_v20 = vadd.f32 %v358_v17, %v342_v14 }
  0xeb   :  { %v360_v19 = vadd.f32 %v359_v20, %v344_v21 }
  0xed   :  { %v361_v22 = vrot.slane %v360_v19, 4 }
  0xef   :  { %v362_v24 = vadd.f32 %v361_v22, %v360_v19 }
  0xf1   :  { %v363_v25 = vrot.slane %v362_v24, 2 }
  0xf3   :  { %v364_v30 = vadd.f32 %v363_v25, %v362_v24 }
  0xf5   :  { %v365_v23 = vrot.slane %v364_v30, 1 }
  0xf7   :  { %v366_v32 = vadd.f32 %v365_v23, %v364_v30 }
  0xf9   :  { %v374_v33 = vmul.f32 %v373_v31, %v366_v32 }
  0xfb   :  { %v963_v18 = vsub.f32 %v943_v28, %v374_v33  ;;  %v966_v34 = vsub.f32 %v941_v26, %v374_v33  ;;  %v969_v36 = vsub.f32 %v945_v29, %v374_v33  ;;  %v976_v40 = vsub.f32 %v949_v35, %v374_v33 }
  0xfc   :  { %v979_v41 = vsub.f32 %v952_v38, %v374_v33  ;;  %v984_v43 = vsub.f32 %v955_v42, %v374_v33  ;;  %v381_v46 = vsub.f32 %v958_v44, %v374_v33  ;;  %v382_v48 = vsub.f32 %v324_v53, %v374_v33 }
  0xfd   :  { %v391_v37 = vmul.f32 %v963_v18, %v963_v18  ;;  %v392_v39 = vmul.f32 %v966_v34, %v966_v34  ;;  %v393_v28 = vmul.f32 %v969_v36, %v969_v36  ;;  %v394_v29 = vmul.f32 %v976_v40, %v976_v40 }
  0xfe   :  { %v395_v35 = vmul.f32 %v979_v41, %v979_v41  ;;  %v396_v38 = vmul.f32 %v984_v43, %v984_v43  ;;  %v383_v50 = vsub.f32 %v327_v54, %v374_v33  ;;  %v397_v51 = vmul.f32 %v381_v46, %v381_v46 }
  0xff   :  { %v407_v26 = vadd.f32 %v392_v39, %v391_v37  ;;  %v384_v42 = vsub.f32 %v329_v58, %v374_v33  ;;  %v398_v55 = vmul.f32 %v382_v48, %v382_v48  ;;  %v385_v57 = vsub.f32 %v332_v62, %v374_v33 }
 0x100   :  { %v399_v59 = vmul.f32 %v383_v50, %v383_v50  ;;  %v386_v61 = vsub.f32 %v334_v1, %v374_v33  ;;  %v387_v0 = vsub.f32 %v337_v8, %v374_v33  ;;  %v388_v53 = vsub.f32 %v339_v3, %v374_v33 }
 0x101   :  { %v408_v45 = vadd.f32 %v407_v26, %v393_v28  ;;  %v400_v44 = vmul.f32 %v384_v42, %v384_v42  ;;  %v401_v2 = vmul.f32 %v385_v57, %v385_v57  ;;  %v389_v9 = vsub.f32 %v342_v14, %v374_v33  ;;  %v757_v28 = vld [vmem:[%s1032_s3] ss:$0 sm:$0xff] }
 0x102   :  { %v402_v5 = vmul.f32 %v386_v61, %v386_v61  ;;  %v403_v12 = vmul.f32 %v387_v0, %v387_v0  ;;  %v390_v10 = vsub.f32 %v344_v21, %v374_v33  ;;  %v404_v13 = vmul.f32 %v388_v53, %v388_v53 }
 0x103   :  { %v409_v47 = vadd.f32 %v408_v45, %v394_v29  ;;  %v405_v16 = vmul.f32 %v389_v9, %v389_v9 }
 0x104   :  { %v406_v62 = vmul.f32 %v390_v10, %v390_v10 }
 0x105   :  { %v410_v49 = vadd.f32 %v409_v47, %v395_v35 }
 0x107   :  { %v411_v52 = vadd.f32 %v410_v49, %v396_v38 }
 0x109   :  { %v412_v56 = vadd.f32 %v411_v52, %v397_v51 }
 0x10b   :  { %v413_v60 = vadd.f32 %v412_v56, %v398_v55 }
 0x10d   :  { %v414_v63 = vadd.f32 %v413_v60, %v399_v59 }
 0x10f   :  { %v415_v4 = vadd.f32 %v414_v63, %v400_v44 }
 0x111   :  { %v416_v6 = vadd.f32 %v415_v4, %v401_v2 }
 0x113   :  { %v417_v54 = vadd.f32 %v416_v6, %v402_v5 }
 0x115   :  { %v418_v58 = vadd.f32 %v417_v54, %v403_v12 }
 0x117   :  { %v419_v7 = vadd.f32 %v418_v58, %v404_v13 }
 0x119   :  { %v420_v17 = vadd.f32 %v419_v7, %v405_v16 }
 0x11b   :  { %v421_v20 = vadd.f32 %v420_v17, %v406_v62 }
 0x11d   :  { %v422_v1 = vrot.slane %v421_v20, 4 }
 0x11f   :  { %v423_v11 = vadd.f32 %v422_v1, %v421_v20 }
 0x121   :  { %v424_v19 = vrot.slane %v423_v11, 2 }
 0x123   :  { %v425_v8 = vadd.f32 %v424_v19, %v423_v11 }
 0x125   :  { %v426_v22 = vrot.slane %v425_v8, 1 }
 0x127   :  { %v427_v15 = vadd.f32 %v426_v22, %v425_v8 }
 0x129   :  { %v428_v3 = vmul.f32 %v427_v15, %v373_v31 }
 0x12b   :  { %v429_v24 = vadd.f32 1e-05, %v428_v3 }
 0x12d   :  { %761 = vrsqrt.f32 %v429_v24  ;;  %vm436_vm2 = vweird.f32 %v429_v24 }
 0x133   :  { %v762_v14 = vpop.eup %761 }
 0x134   :  { %v431_v25 = vmul.f32 %v762_v14, %v429_v24  ;;  %vm437_vm1 = vweird.f32 %v762_v14 }
 0x135   :  { %vm438_vm3 = vmor %vm436_vm2, %vm437_vm1 }
 0x136   :  { %v432_v27 = vmul.f32 %v762_v14, %v431_v25 }
 0x138   :  { %v433_v21 = vmul.f32 0.5, %v432_v27 }
 0x13a   :  { %v434_v30 = vsub.f32 1.5, %v433_v21 }
 0x13c   :  { %v435_v23 = vmul.f32 %v762_v14, %v434_v30 }
 0x13e   :  { %v439_v32 = vsel %vm438_vm3, %v762_v14, %v435_v23 }
 0x13f   :  { %v440_v33 = vmul.f32 %v439_v32, %v963_v18  ;;  %v441_v37 = vmul.f32 %v439_v32, %v966_v34  ;;  %v442_v39 = vmul.f32 %v439_v32, %v969_v36  ;;  %v443_v31 = vmul.f32 %v439_v32, %v976_v40 }
 0x140   :  { %v444_v26 = vmul.f32 %v439_v32, %v979_v41  ;;  %v445_v29 = vmul.f32 %v439_v32, %v984_v43  ;;  %v446_v45 = vmul.f32 %v439_v32, %v381_v46  ;;  %v447_v35 = vmul.f32 %v439_v32, %v382_v48  ;;  %v758_v41 = vld [vmem:[%s1033_s4] ss:$0 sm:$0xff] }
 0x141   :  { %v448_v47 = vmul.f32 %v439_v32, %v383_v50  ;;  %v449_v38 = vmul.f32 %v439_v32, %v384_v42  ;;  %v450_v49 = vmul.f32 %v439_v32, %v385_v57  ;;  %v451_v18 = vmul.f32 %v439_v32, %v386_v61 }
 0x142   :  { %v452_v51 = vmul.f32 %v439_v32, %v387_v0  ;;  %v453_v34 = vmul.f32 %v439_v32, %v388_v53  ;;  %v454_v52 = vmul.f32 %v439_v32, %v389_v9  ;;  %v455_v36 = vmul.f32 %v439_v32, %v390_v10 }
 0x143   :  { %v460_v55 = vmul.f32 %v757_v28, %v440_v33  ;;  %v461_v40 = vmul.f32 %v757_v28, %v441_v37  ;;  %v462_v56 = vmul.f32 %v757_v28, %v442_v39  ;;  %v463_v59 = vmul.f32 %v757_v28, %v443_v31 }
 0x144   :  { %v464_v60 = vmul.f32 %v757_v28, %v444_v26  ;;  %v465_v43 = vmul.f32 %v757_v28, %v445_v29  ;;  %v466_v46 = vmul.f32 %v757_v28, %v446_v45  ;;  %v467_v48 = vmul.f32 %v757_v28, %v447_v35 }
 0x145   :  { %v468_v50 = vmul.f32 %v757_v28, %v448_v47  ;;  %v469_v42 = vmul.f32 %v757_v28, %v449_v38  ;;  %v470_v57 = vmul.f32 %v757_v28, %v450_v49  ;;  %v471_v61 = vmul.f32 %v757_v28, %v451_v18 }
 0x146   :  { %v472_v44 = vmul.f32 %v757_v28, %v452_v51  ;;  %v473_v63 = vmul.f32 %v757_v28, %v453_v34  ;;  %v474_v0 = vmul.f32 %v757_v28, %v454_v52  ;;  %v475_v2 = vmul.f32 %v757_v28, %v455_v36 }
 0x147   :  { %v480_v4 = vadd.f32 %v758_v41, %v460_v55  ;;  %v481_v53 = vadd.f32 %v758_v41, %v461_v40  ;;  %v482_v5 = vadd.f32 %v758_v41, %v462_v56  ;;  %v483_v6 = vadd.f32 %v758_v41, %v463_v59 }
 0x148   :  { %v484_v9 = vadd.f32 %v758_v41, %v464_v60  ;;  %v485_v12 = vadd.f32 %v758_v41, %v465_v43  ;;  %v486_v54 = vadd.f32 %v758_v41, %v466_v46  ;;  %v487_v10 = vadd.f32 %v758_v41, %v467_v48 }
 0x149   :  { %v488_v13 = vadd.f32 %v758_v41, %v468_v50  ;;  %v489_v58 = vadd.f32 %v758_v41, %v469_v42  ;;  %v490_v16 = vadd.f32 %v758_v41, %v470_v57  ;;  %v491_v7 = vadd.f32 %v758_v41, %v471_v61 }
 0x14a   :  { %v492_v62 = vadd.f32 %v758_v41, %v472_v44  ;;  %v493_v17 = vadd.f32 %v758_v41, %v473_v63  ;;  %v695_v20 = vpack.c.bf16 %v481_v53, %v480_v4  ;;  %v700_v1 = vpack.c.bf16 %v483_v6, %v482_v5 }
 0x14b   :  { %v705_v11 = vpack.c.bf16 %v485_v12, %v484_v9  ;;  %v494_v19 = vadd.f32 %v758_v41, %v474_v0  ;;  %v495_v8 = vadd.f32 %v758_v41, %v475_v2  ;;  %v710_v22 = vpack.c.bf16 %v487_v10, %v486_v54 }
 0x14c   :  { %696 = vst [vmem:[%s1034_s5] sm:$0xff] %v695_v20   ;;  %v715_v15 = vpack.c.bf16 %v489_v58, %v488_v13  ;;  %v720_v3 = vpack.c.bf16 %v491_v7, %v490_v16  ;;  %v725_v24 = vpack.c.bf16 %v493_v17, %v492_v62 }
 0x14d   :  { %732 = vst [vmem:[%s1034_s5 + $0x8] sm:$0xff] %v700_v1   ;;  %v730_v14 = vpack.c.bf16 %v495_v8, %v494_v19 }
 0x14e   :  { %733 = vst [vmem:[%s1034_s5 + $0x10] sm:$0xff] %v705_v11  }
 0x14f   :  { %734 = vst [vmem:[%s1034_s5 + $0x18] sm:$0xff] %v710_v22  }
 0x150   :  { %735 = vst [vmem:[%s1034_s5 + $0x20] sm:$0xff] %v715_v15  }
 0x151   :  { %736 = vst [vmem:[%s1034_s5 + $0x28] sm:$0xff] %v720_v3  }
 0x152   :  { %737 = vst [vmem:[%s1034_s5 + $0x30] sm:$0xff] %v725_v24  }
 0x153   :  { %738 = vst [vmem:[%s1034_s5 + $0x38] sm:$0xff] %v730_v14  }

// kernel: shap_autoencoder2_forward.7
= control target key start
LH: loop header
LB: loop body
LE: loop exit
PB: predicated region body
PF: predicated region fallthrough
CT: control target
= control target key end

     0   :  { %s439_s1 = inlined_call_operand.vmem [shape: bf16[128,128], index: 1, kind: input, shape index: {}]   ;;  %s440_s2 = inlined_call_operand.vmem [shape: f32[1,128], index: 2, kind: input, shape index: {}]   ;;  %s441_s0 = inlined_call_operand.vmem [shape: bf16[128,128], index: 0, kind: input, shape index: {}]   ;;  %s442_s3 = inlined_call_operand.vmem [shape: f32[128,128], index: 3, kind: output, shape index: {}]  }
   0x1   :  { %v294_v0 = vld [vmem:[%s439_s1 + $0x38] sm:$0xff]  ;;  %v293_v1 = vld [vmem:[%s439_s1 + $0x30] sm:$0xff]  ;;  %v292_v2 = vld [vmem:[%s439_s1 + $0x28] sm:$0xff] }
   0x2   :  { %146 = vmatpush.bf16.msra.mxu0 %v294_v0  ;;  %295 = vmatpush.bf16.msra.mxu1 %v294_v0  ;;  %v291_v3 = vld [vmem:[%s439_s1 + $0x20] sm:$0xff]  ;;  %v290_v4 = vld [vmem:[%s439_s1 + $0x18] sm:$0xff]  ;;  %v289_v5 = vld [vmem:[%s439_s1 + $0x10] sm:$0xff] }
   0x3   :  { %296 = vmatpush.bf16.msra.mxu2 %v294_v0  ;;  %297 = vmatpush.bf16.msra.mxu3 %v294_v0  ;;  %v288_v6 = vld [vmem:[%s439_s1 + $0x8] sm:$0xff]  ;;  %v287_v7 = vld [vmem:[%s439_s1] sm:$0xff]  ;;  %v281_v9 = vld [vmem:[%s441_s0 + $0x10] sm:$0xff] }
   0x4   :  { %v279_v8 = vld [vmem:[%s441_s0] sm:$0xff]  ;;  %v285_v11 = vld [vmem:[%s441_s0 + $0x30] sm:$0xff]  ;;  %v280_v12 = vld [vmem:[%s441_s0 + $0x8] sm:$0xff] }
   0x5   :  { %v283_v10 = vld [vmem:[%s441_s0 + $0x20] sm:$0xff]  ;;  %v282_v13 = vld [vmem:[%s441_s0 + $0x18] sm:$0xff]  ;;  %v284_v14 = vld [vmem:[%s441_s0 + $0x28] sm:$0xff] }
   0x6   :  { %147 = vmatpush.bf16.msra.mxu0 %v293_v1  ;;  %298 = vmatpush.bf16.msra.mxu1 %v293_v1  ;;  %v286_v15 = vld [vmem:[%s441_s0 + $0x38] sm:$0xff]  ;;  %v319_v16 = vld [vmem:[%s440_s2] ss:$0 sm:$0xff] }
   0x7   :  { %299 = vmatpush.bf16.msra.mxu2 %v293_v1  ;;  %300 = vmatpush.bf16.msra.mxu3 %v293_v1 }
   0xa   :  { %148 = vmatpush.bf16.msra.mxu0 %v292_v2  ;;  %301 = vmatpush.bf16.msra.mxu1 %v292_v2 }
   0xb   :  { %302 = vmatpush.bf16.msra.mxu2 %v292_v2  ;;  %303 = vmatpush.bf16.msra.mxu3 %v292_v2 }
   0xe   :  { %149 = vmatpush.bf16.msra.mxu0 %v291_v3  ;;  %304 = vmatpush.bf16.msra.mxu1 %v291_v3 }
   0xf   :  { %305 = vmatpush.bf16.msra.mxu2 %v291_v3  ;;  %306 = vmatpush.bf16.msra.mxu3 %v291_v3 }
  0x12   :  { %150 = vmatpush.bf16.msra.mxu0 %v290_v4  ;;  %307 = vmatpush.bf16.msra.mxu1 %v290_v4 }
  0x13   :  { %308 = vmatpush.bf16.msra.mxu2 %v290_v4  ;;  %309 = vmatpush.bf16.msra.mxu3 %v290_v4 }
  0x16   :  { %151 = vmatpush.bf16.msra.mxu0 %v289_v5  ;;  %310 = vmatpush.bf16.msra.mxu1 %v289_v5 }
  0x17   :  { %311 = vmatpush.bf16.msra.mxu2 %v289_v5  ;;  %312 = vmatpush.bf16.msra.mxu3 %v289_v5 }
  0x1a   :  { %152 = vmatpush.bf16.msra.mxu0 %v288_v6  ;;  %313 = vmatpush.bf16.msra.mxu1 %v288_v6 }
  0x1b   :  { %314 = vmatpush.bf16.msra.mxu2 %v288_v6  ;;  %315 = vmatpush.bf16.msra.mxu3 %v288_v6 }
  0x1e   :  { %153 = vmatpush.bf16.msra.mxu0 %v287_v7  ;;  %316 = vmatpush.bf16.msra.mxu1 %v287_v7 }
  0x1f   :  { %317 = vmatpush.bf16.msra.mxu2 %v287_v7  ;;  %318 = vmatpush.bf16.msra.mxu3 %v287_v7 }
  0x21   :  { %154 = vmatmul.bf16.vlgmr.msra.gmra.mxu0 %v279_v8  ;;  %164 = vmatmul.bf16.vlgmr.msra.gmra.mxu1 %v281_v9 }
  0x22   :  { %174 = vmatmul.bf16.vlgmr.msra.gmra.mxu2 %v283_v10  ;;  %184 = vmatmul.bf16.vlgmr.msra.gmra.mxu3 %v285_v11 }
  0x31   :  { %159 = vmatmul.bf16.gmra.mxu0 %v280_v12  ;;  %169 = vmatmul.bf16.gmra.mxu1 %v282_v13 }
  0x32   :  { %179 = vmatmul.bf16.gmra.mxu2 %v284_v14  ;;  %189 = vmatmul.bf16.gmra.mxu3 %v286_v15 }
  0x9e   :  { %v155_v17 = vpop.f32.mrf.mxu0  ;;  %v165_v18 = vpop.f32.mrf.mxu1 }
  0x9f   :  { %v156_v19 = vadd.f32 %v319_v16, %v155_v17  ;;  %v166_v20 = vadd.f32 %v319_v16, %v165_v18 }
  0xa1   :  { %195 = vst [vmem:[%s442_s3] sm:$0xff] %v156_v19 }
  0xa2   :  { %199 = vst [vmem:[%s442_s3 + $0x20] sm:$0xff] %v166_v20 }
  0xa5   :  { %v175_v21 = vpop.f32.mrf.mxu2  ;;  %v185_v22 = vpop.f32.mrf.mxu3 }
  0xa6   :  { %v176_v23 = vadd.f32 %v319_v16, %v175_v21  ;;  %v186_v24 = vadd.f32 %v319_v16, %v185_v22  ;;  %v157_v25 = vpop.f32.mrf.mxu0  ;;  %v167_v26 = vpop.f32.mrf.mxu1 }
  0xa7   :  { %v158_v27 = vadd.f32 %v319_v16, %v157_v25  ;;  %v168_v28 = vadd.f32 %v319_v16, %v167_v26 }
  0xa8   :  { %203 = vst [vmem:[%s442_s3 + $0x40] sm:$0xff] %v176_v23 }
  0xa9   :  { %207 = vst [vmem:[%s442_s3 + $0x60] sm:$0xff] %v186_v24 }
  0xaa   :  { %196 = vst [vmem:[%s442_s3 + $0x8] sm:$0xff] %v158_v27 }
  0xab   :  { %200 = vst [vmem:[%s442_s3 + $0x28] sm:$0xff] %v168_v28 }
  0xad   :  { %v177_v29 = vpop.f32.mrf.mxu2  ;;  %v187_v30 = vpop.f32.mrf.mxu3 }
  0xae   :  { %v178_v31 = vadd.f32 %v319_v16, %v177_v29  ;;  %v188_v32 = vadd.f32 %v319_v16, %v187_v30  ;;  %v160_v33 = vpop.f32.mrf.mxu0  ;;  %v170_v34 = vpop.f32.mrf.mxu1 }
  0xaf   :  { %v161_v35 = vadd.f32 %v319_v16, %v160_v33  ;;  %v171_v36 = vadd.f32 %v319_v16, %v170_v34 }
  0xb0   :  { %204 = vst [vmem:[%s442_s3 + $0x48] sm:$0xff] %v178_v31 }
  0xb1   :  { %208 = vst [vmem:[%s442_s3 + $0x68] sm:$0xff] %v188_v32 }
  0xb2   :  { %197 = vst [vmem:[%s442_s3 + $0x10] sm:$0xff] %v161_v35 }
  0xb3   :  { %201 = vst [vmem:[%s442_s3 + $0x30] sm:$0xff] %v171_v36 }
  0xb5   :  { %v180_v37 = vpop.f32.mrf.mxu2  ;;  %v190_v38 = vpop.f32.mrf.mxu3 }
  0xb6   :  { %v181_v39 = vadd.f32 %v319_v16, %v180_v37  ;;  %v191_v40 = vadd.f32 %v319_v16, %v190_v38  ;;  %v162_v41 = vpop.f32.mrf.mxu0  ;;  %v172_v42 = vpop.f32.mrf.mxu1 }
  0xb7   :  { %v163_v43 = vadd.f32 %v319_v16, %v162_v41  ;;  %v173_v44 = vadd.f32 %v319_v16, %v172_v42 }
  0xb8   :  { %205 = vst [vmem:[%s442_s3 + $0x50] sm:$0xff] %v181_v39 }
  0xb9   :  { %209 = vst [vmem:[%s442_s3 + $0x70] sm:$0xff] %v191_v40 }
  0xba   :  { %198 = vst [vmem:[%s442_s3 + $0x18] sm:$0xff] %v163_v43 }
  0xbb   :  { %202 = vst [vmem:[%s442_s3 + $0x38] sm:$0xff] %v173_v44 }
  0xbd   :  { %v182_v45 = vpop.f32.mrf.mxu2  ;;  %v192_v46 = vpop.f32.mrf.mxu3 }
  0xbe   :  { %v183_v47 = vadd.f32 %v319_v16, %v182_v45  ;;  %v193_v48 = vadd.f32 %v319_v16, %v192_v46 }
  0xc0   :  { %206 = vst [vmem:[%s442_s3 + $0x58] sm:$0xff] %v183_v47 }
  0xc1   :  { %210 = vst [vmem:[%s442_s3 + $0x78] sm:$0xff] %v193_v48 }

// kernel: shap_autoencoder2_forward.4
= control target key start
LH: loop header
LB: loop body
LE: loop exit
PB: predicated region body
PF: predicated region fallthrough
CT: control target
= control target key end

     0   :  { %s1500_s18 = smov 0   ;;  %s1502_s19 = smov 0   ;;  %s1873_s0 = inlined_call_operand.vmem [shape: bf16[128,256], index: 0, kind: input, shape index: {}]   ;;  %s1874_s1 = inlined_call_operand.vmem [shape: bf16[256,256], index: 1, kind: input, shape index: {}]   ;;  %s1875_s2 = inlined_call_operand.vmem [shape: f32[1,256], index: 2, kind: input, shape index: {}]   ;;  %s1876_s3 = inlined_call_operand.vmem [shape: f32[1,256], index: 3, kind: input, shape index: {}]   ;;  %s1877_s4 = inlined_call_operand.vmem [shape: f32[1,256], index: 4, kind: input, shape index: {}]   ;;  %s1878_s5 = inlined_call_operand.vmem [shape: bf16[128,256], index: 5, kind: output, shape index: {}]  }
   0x1   :  { %s1504_s20 = smov 0  }
   0x2 LB: > { %s1516_s21 = sadd.s32 4294967295, %s1467_s20   ;;  %s1519_s22 = sadd.s32 1, %s1467_s20   ;;  %s1467_s20 = sphi %s1504_s20, %s1882_s20   ;;  %s1463_s19 = sphi %s1502_s19, %s1881_s19   ;;  %s1459_s18 = sphi %s1500_s18, %s1880_s18  }
   0x3   : > { %s40_s23 = ssub.s32 %s1467_s20, %s1519_s22  ;;  %s43_s24 = sadd.s32 1, %s1463_s19 }
   0x4   : > { %p41_p0 = scmp.eq.s32.totalorder %s40_s23, 0  ;;  %p50_p1 = scmp.ne.s32.totalorder %s1463_s19, %s1459_s18 }
   0x5   : > { %p51_p2 = scmp.eq.s32.totalorder %s1467_s20, 0  ;;  %p158_p3 = scmp.eq.s32.totalorder %s1516_s21, 1 }
   0x6   : > { %s1529_s25 = scalar_select %p41_p0, %s1463_s19, %s43_s24  }
   0x7   : > { %p52_p4 = por %p51_p2, %p50_p1  ;;  %p1531_p5 = por %p158_p3, %p50_p1 }
   0x8   : > { %p1180_p6 = scmp.ge.s32.totalorder %s1467_s20, 2 }
   0xa   : > { %183 = sbr.rel (%p1180_p6) target bundleno = 51 (0x33), region = 20 }
   0xf   : > { %186 = sbr.rel (!%p52_p4) target bundleno = 51 (0x33), region = 24  ;;  %s188_s27 = sand.u32 (%p52_p4), 1, %s1463_s19  }
  0x10   : > { %s1182_s28 = sshll.u32 (%p52_p4), %s1467_s20, 2  ;;  %s1181_s29 = sshll.u32 (%p52_p4), %s188_s27, 7 }
  0x11   : > { %s1541_s7 = scalar_lea.vmem (%p52_p4), %s1874_s1, %s1182_s28  ;;  %s1545_s8 = scalar_lea.vmem (%p52_p4), [#allocation2], %s1181_s29 }
  0x12   : > { %v209_v0 = vld [vmem:[%s1541_s7] sm:$0xf] (%p52_p4)  ;;  %v211_v1 = vld [vmem:[%s1541_s7 + $0x8] sm:$0xf] (%p52_p4)  ;;  %v213_v2 = vld [vmem:[%s1541_s7 + $0x10] sm:$0xf] (%p52_p4) }
  0x13   : > { %210 = vst [vmem:[%s1545_s8] sm:$0xf] (%p52_p4), %v209_v0  ;;  %v215_v3 = vld [vmem:[%s1541_s7 + $0x18] sm:$0xf] (%p52_p4)  ;;  %v217_v4 = vld [vmem:[%s1541_s7 + $0x20] sm:$0xf] (%p52_p4) }
  0x14   : > { %212 = vst [vmem:[%s1545_s8 + $0x4] sm:$0xf] %v211_v1  ;;  %v219_v5 = vld [vmem:[%s1541_s7 + $0x28] sm:$0xf]  ;;  %v221_v6 = vld [vmem:[%s1541_s7 + $0x30] sm:$0xf] }
  0x15   : > { %214 = vst [vmem:[%s1545_s8 + $0x8] sm:$0xf] %v213_v2  ;;  %v223_v7 = vld [vmem:[%s1541_s7 + $0x38] sm:$0xf]  ;;  %v225_v8 = vld [vmem:[%s1541_s7 + $0x40] sm:$0xf] }
  0x16   : > { %216 = vst [vmem:[%s1545_s8 + $0xc] sm:$0xf] %v215_v3  ;;  %v227_v9 = vld [vmem:[%s1541_s7 + $0x48] sm:$0xf]  ;;  %v229_v10 = vld [vmem:[%s1541_s7 + $0x50] sm:$0xf] }
  0x17   : > { %218 = vst [vmem:[%s1545_s8 + $0x10] sm:$0xf] %v217_v4  ;;  %v231_v11 = vld [vmem:[%s1541_s7 + $0x58] sm:$0xf]  ;;  %v233_v12 = vld [vmem:[%s1541_s7 + $0x60] sm:$0xf] }
  0x18   : > { %220 = vst [vmem:[%s1545_s8 + $0x14] sm:$0xf] %v219_v5  ;;  %v235_v13 = vld [vmem:[%s1541_s7 + $0x68] sm:$0xf]  ;;  %v237_v14 = vld [vmem:[%s1541_s7 + $0x70] sm:$0xf] }
  0x19   : > { %222 = vst [vmem:[%s1545_s8 + $0x18] sm:$0xf] %v221_v6  ;;  %v239_v15 = vld [vmem:[%s1541_s7 + $0x78] sm:$0xf]  ;;  %v241_v16 = vld [vmem:[%s1541_s7 + $0x80] sm:$0xf] }
  0x1a   : > { %224 = vst [vmem:[%s1545_s8 + $0x1c] sm:$0xf] %v223_v7  ;;  %v243_v17 = vld [vmem:[%s1541_s7 + $0x88] sm:$0xf]  ;;  %v245_v18 = vld [vmem:[%s1541_s7 + $0x90] sm:$0xf] }
  0x1b   : > { %226 = vst [vmem:[%s1545_s8 + $0x20] sm:$0xf] %v225_v8  ;;  %v247_v19 = vld [vmem:[%s1541_s7 + $0x98] sm:$0xf]  ;;  %v249_v20 = vld [vmem:[%s1541_s7 + $0xa0] sm:$0xf] }
  0x1c   : > { %228 = vst [vmem:[%s1545_s8 + $0x24] sm:$0xf] %v227_v9  ;;  %v251_v21 = vld [vmem:[%s1541_s7 + $0xa8] sm:$0xf]  ;;  %v253_v22 = vld [vmem:[%s1541_s7 + $0xb0] sm:$0xf] }
  0x1d   : > { %230 = vst [vmem:[%s1545_s8 + $0x28] sm:$0xf] %v229_v10  ;;  %v255_v23 = vld [vmem:[%s1541_s7 + $0xb8] sm:$0xf]  ;;  %v257_v24 = vld [vmem:[%s1541_s7 + $0xc0] sm:$0xf] }
  0x1e   : > { %232 = vst [vmem:[%s1545_s8 + $0x2c] sm:$0xf] %v231_v11  ;;  %v259_v25 = vld [vmem:[%s1541_s7 + $0xc8] sm:$0xf]  ;;  %v261_v26 = vld [vmem:[%s1541_s7 + $0xd0] sm:$0xf] }
  0x1f   : > { %234 = vst [vmem:[%s1545_s8 + $0x30] sm:$0xf] %v233_v12  ;;  %v263_v27 = vld [vmem:[%s1541_s7 + $0xd8] sm:$0xf]  ;;  %v265_v28 = vld [vmem:[%s1541_s7 + $0xe0] sm:$0xf] }
  0x20   : > { %236 = vst [vmem:[%s1545_s8 + $0x34] sm:$0xf] %v235_v13  ;;  %v267_v29 = vld [vmem:[%s1541_s7 + $0xe8] sm:$0xf]  ;;  %v269_v30 = vld [vmem:[%s1541_s7 + $0xf0] sm:$0xf] }
  0x21   : > { %238 = vst [vmem:[%s1545_s8 + $0x38] sm:$0xf] %v237_v14  ;;  %v271_v31 = vld [vmem:[%s1541_s7 + $0xf8] sm:$0xf] }
  0x22   : > { %240 = vst [vmem:[%s1545_s8 + $0x3c] sm:$0xf] %v239_v15 }
  0x23   : > { %242 = vst [vmem:[%s1545_s8 + $0x40] sm:$0xf] %v241_v16 }
  0x24   : > { %244 = vst [vmem:[%s1545_s8 + $0x44] sm:$0xf] %v243_v17 }
  0x25   : > { %246 = vst [vmem:[%s1545_s8 + $0x48] sm:$0xf] %v245_v18 }
  0x26   : > { %248 = vst [vmem:[%s1545_s8 + $0x4c] sm:$0xf] %v247_v19 }
  0x27   : > { %250 = vst [vmem:[%s1545_s8 + $0x50] sm:$0xf] %v249_v20 }
  0x28   : > { %252 = vst [vmem:[%s1545_s8 + $0x54] sm:$0xf] %v251_v21 }
  0x29   : > { %254 = vst [vmem:[%s1545_s8 + $0x58] sm:$0xf] %v253_v22 }
  0x2a   : > { %256 = vst [vmem:[%s1545_s8 + $0x5c] sm:$0xf] %v255_v23 }
  0x2b   : > { %258 = vst [vmem:[%s1545_s8 + $0x60] sm:$0xf] %v257_v24 }
  0x2c   : > { %260 = vst [vmem:[%s1545_s8 + $0x64] sm:$0xf] %v259_v25 }
  0x2d   : > { %262 = vst [vmem:[%s1545_s8 + $0x68] sm:$0xf] %v261_v26 }
  0x2e   : > { %264 = vst [vmem:[%s1545_s8 + $0x6c] sm:$0xf] %v263_v27 }
  0x2f   : > { %266 = vst [vmem:[%s1545_s8 + $0x70] sm:$0xf] %v265_v28 }
  0x30   : > { %268 = vst [vmem:[%s1545_s8 + $0x74] sm:$0xf] %v267_v29 }
  0x31   : > { %270 = vst [vmem:[%s1545_s8 + $0x78] sm:$0xf] %v269_v30 }
  0x32   : > { %272 = vst [vmem:[%s1545_s8 + $0x7c] sm:$0xf] %v271_v31 }
  0x33 PF: > { %p1183_p7 = scmp.ge.s32.totalorder %s1467_s20, 1  ;;  %p377_p8 = scmp.lt.s32.totalorder %s1467_s20, 3 }
  0x35   : > { %p378_p9 = pnand %p1183_p7, %p377_p8 }
  0x36   : > { %s384_s9 = sand.u32 (!%p378_p9), 1, %s1459_s18   ;;  %p419_p10 = scmp.lt.s32.totalorder (!%p378_p9), %s1516_s21, 1 }
  0x37   : > { %381 = sbr.rel (%p378_p9) target bundleno = 427 (0x1ab), region = 77  ;;  %s1184_s10 = sshll.u32 (!%p378_p9), %s384_s9, 7 }
  0x38   : > { %s1615_s11 = scalar_lea.vmem (!%p378_p9), [#allocation2], %s1184_s10 }
  0x3c   : > { %v1341_v32 = vld [vmem:[%s1615_s11 + $0x38] sm:$0xff]  ;;  %v1340_v34 = vld [vmem:[%s1615_s11 + $0x30] sm:$0xff]  ;;  %s1622_s12 = scalar_select %p419_p10, %s1516_s21, 1  ;;  %v1339_v36 = vld [vmem:[%s1615_s11 + $0x28] sm:$0xff] }
  0x3d   : > { %v1349_v33 = vld [vmem:[%s1615_s11 + $0x78] sm:$0xff]  ;;  %656 = vmatpush.bf16.msra.mxu0 %v1341_v32  ;;  %v1348_v35 = vld [vmem:[%s1615_s11 + $0x70] sm:$0xff]  ;;  %1397 = vmatpush.bf16.msra.mxu2 %v1341_v32  ;;  %v1347_v37 = vld [vmem:[%s1615_s11 + $0x68] sm:$0xff] }
  0x3e   : > { %705 = vmatpush.bf16.msra.mxu1 %v1349_v33  ;;  %1405 = vmatpush.bf16.msra.mxu3 %v1349_v33  ;;  %s421_s15 = scalar_lea.vmem %s1875_s2, %s1622_s12  ;;  %v1338_v38 = vld [vmem:[%s1615_s11 + $0x20] sm:$0xff]  ;;  %v1337_v40 = vld [vmem:[%s1615_s11 + $0x18] sm:$0xff]  ;;  %v1336_v42 = vld [vmem:[%s1615_s11 + $0x10] sm:$0xff]  ;;  %s424_s20 = scalar_lea.vmem %s1876_s3, %s1622_s12 }
  0x3f   : > { %v1346_v39 = vld [vmem:[%s1615_s11 + $0x60] sm:$0xff]  ;;  %v1345_v41 = vld [vmem:[%s1615_s11 + $0x58] sm:$0xff]  ;;  %v1344_v43 = vld [vmem:[%s1615_s11 + $0x50] sm:$0xff]  ;;  %s427_s27 = scalar_lea.vmem %s1877_s4, %s1622_s12  ;;  %s1814_s12 = sshll.u32 %s384_s9, 6 }
  0x40   : > { %v1335_v44 = vld [vmem:[%s1615_s11 + $0x8] sm:$0xff]  ;;  %v1188_v46 = vld [vmem:[%s1873_s0] sm:$0xf]  ;;  %v1318_v48 = vld [vmem:[%s1873_s0 + $0x4] sm:$0xf]  ;;  %s1831_s18 = scalar_lea.vmem [#allocation3], %s1814_s12 }
  0x41   : > { %657 = vmatpush.bf16.msra.mxu0 %v1340_v34  ;;  %1398 = vmatpush.bf16.msra.mxu2 %v1340_v34  ;;  %v1343_v45 = vld [vmem:[%s1615_s11 + $0x48] sm:$0xff]  ;;  %v1334_v50 = vld [vmem:[%s1615_s11] sm:$0xff]  ;;  %v1196_v60 = vld [vmem:[%s1873_s0 + $0x10] sm:$0xf]  ;;  %s1315_s9 = sshll.u32 (%p1531_p5), %s1516_s21, 2 }
  0x42   : > { %706 = vmatpush.bf16.msra.mxu1 %v1348_v35  ;;  %1406 = vmatpush.bf16.msra.mxu3 %v1348_v35  ;;  %v1319_v47 = vld [vmem:[%s1873_s0 + $0x4] sm:$0xf0]  ;;  %v1190_v49 = vld [vmem:[%s1873_s0 + $0x8] sm:$0xf0]  ;;  %v1342_v51 = vld [vmem:[%s1615_s11 + $0x40] sm:$0xff]  ;;  %s992_s13 = scalar_lea.vmem (%p1531_p5), %s1878_s5, %s1315_s9 }
  0x43   : > { %v1220_v52 = vld [vmem:[%s1873_s0 + $0x40] sm:$0xf]  ;;  %v1327_v53 = vld [vmem:[%s1873_s0 + $0x44] sm:$0xf0]  ;;  %v1326_v54 = vld [vmem:[%s1873_s0 + $0x44] sm:$0xf]  ;;  %v1189_v56 = vor.u32 %v1319_v47, %v1188_v46  ;;  %v1193_v57 = vor.u32 %v1318_v48, %v1190_v49 }
  0x44   : > { %v1222_v55 = vld [vmem:[%s1873_s0 + $0x48] sm:$0xf0]  ;;  %v1221_v58 = vor.u32 %v1327_v53, %v1220_v52  ;;  %v1321_v61 = vld [vmem:[%s1873_s0 + $0x14] sm:$0xf0]  ;;  %v1320_v62 = vld [vmem:[%s1873_s0 + $0x14] sm:$0xf] }
  0x45   : > { %658 = vmatpush.bf16.msra.mxu0 %v1339_v36  ;;  %1399 = vmatpush.bf16.msra.mxu2 %v1339_v36  ;;  %v1225_v59 = vor.u32 %v1326_v54, %v1222_v55  ;;  %v1198_v63 = vld [vmem:[%s1873_s0 + $0x18] sm:$0xf0]  ;;  %v1228_v0 = vld [vmem:[%s1873_s0 + $0x50] sm:$0xf]  ;;  %v1329_v1 = vld [vmem:[%s1873_s0 + $0x54] sm:$0xf0]  ;;  %v1197_v4 = vor.u32 %v1321_v61, %v1196_v60 }
  0x46   : > { %707 = vmatpush.bf16.msra.mxu1 %v1347_v37  ;;  %1407 = vmatpush.bf16.msra.mxu3 %v1347_v37  ;;  %v1328_v2 = vld [vmem:[%s1873_s0 + $0x54] sm:$0xf]  ;;  %v1230_v3 = vld [vmem:[%s1873_s0 + $0x58] sm:$0xf0]  ;;  %v1201_v5 = vor.u32 %v1320_v62, %v1198_v63  ;;  %v1229_v6 = vor.u32 %v1329_v1, %v1228_v0  ;;  %v1204_v8 = vld [vmem:[%s1873_s0 + $0x20] sm:$0xf] }
  0x47   : > { %v1233_v7 = vor.u32 %v1328_v2, %v1230_v3  ;;  %v1323_v9 = vld [vmem:[%s1873_s0 + $0x24] sm:$0xf0]  ;;  %v1322_v10 = vld [vmem:[%s1873_s0 + $0x24] sm:$0xf]  ;;  %v1206_v11 = vld [vmem:[%s1873_s0 + $0x28] sm:$0xf0] }
  0x48   : > { %v1236_v12 = vld [vmem:[%s1873_s0 + $0x60] sm:$0xf]  ;;  %v1331_v13 = vld [vmem:[%s1873_s0 + $0x64] sm:$0xf0]  ;;  %v1330_v14 = vld [vmem:[%s1873_s0 + $0x64] sm:$0xf]  ;;  %v1205_v16 = vor.u32 %v1323_v9, %v1204_v8  ;;  %v1209_v17 = vor.u32 %v1322_v10, %v1206_v11 }
  0x49   : > { %659 = vmatpush.bf16.msra.mxu0 %v1338_v38  ;;  %1400 = vmatpush.bf16.msra.mxu2 %v1338_v38  ;;  %v1238_v15 = vld [vmem:[%s1873_s0 + $0x68] sm:$0xf0]  ;;  %v1237_v18 = vor.u32 %v1331_v13, %v1236_v12  ;;  %v1212_v20 = vld [vmem:[%s1873_s0 + $0x30] sm:$0xf]  ;;  %v1325_v21 = vld [vmem:[%s1873_s0 + $0x34] sm:$0xf0] }
  0x4a   : > { %708 = vmatpush.bf16.msra.mxu1 %v1346_v39  ;;  %1408 = vmatpush.bf16.msra.mxu3 %v1346_v39  ;;  %v1241_v19 = vor.u32 %v1330_v14, %v1238_v15  ;;  %v1324_v22 = vld [vmem:[%s1873_s0 + $0x34] sm:$0xf]  ;;  %v1214_v23 = vld [vmem:[%s1873_s0 + $0x38] sm:$0xf0]  ;;  %v1244_v24 = vld [vmem:[%s1873_s0 + $0x70] sm:$0xf]  ;;  %v1213_v28 = vor.u32 %v1325_v21, %v1212_v20 }
  0x4b   : > { %v1333_v25 = vld [vmem:[%s1873_s0 + $0x74] sm:$0xf0]  ;;  %v1332_v26 = vld [vmem:[%s1873_s0 + $0x74] sm:$0xf]  ;;  %v1246_v27 = vld [vmem:[%s1873_s0 + $0x78] sm:$0xf0]  ;;  %v1217_v29 = vor.u32 %v1324_v22, %v1214_v23 }
  0x4c   : > { %v1245_v30 = vor.u32 %v1333_v25, %v1244_v24  ;;  %v1249_v31 = vor.u32 %v1332_v26, %v1246_v27 }
  0x4d   : > { %660 = vmatpush.bf16.msra.mxu0 %v1337_v40  ;;  %1401 = vmatpush.bf16.msra.mxu2 %v1337_v40 }
  0x4e   : > { %709 = vmatpush.bf16.msra.mxu1 %v1345_v41  ;;  %1409 = vmatpush.bf16.msra.mxu3 %v1345_v41 }
  0x51   : > { %661 = vmatpush.bf16.msra.mxu0 %v1336_v42  ;;  %1402 = vmatpush.bf16.msra.mxu2 %v1336_v42 }
  0x52   : > { %710 = vmatpush.bf16.msra.mxu1 %v1344_v43  ;;  %1410 = vmatpush.bf16.msra.mxu3 %v1344_v43 }
  0x55   : > { %662 = vmatpush.bf16.msra.mxu0 %v1335_v44  ;;  %1403 = vmatpush.bf16.msra.mxu2 %v1335_v44 }
  0x56   : > { %711 = vmatpush.bf16.msra.mxu1 %v1343_v45  ;;  %1411 = vmatpush.bf16.msra.mxu3 %v1343_v45 }
  0x59   : > { %663 = vmatpush.bf16.msra.mxu0 %v1334_v50  ;;  %1404 = vmatpush.bf16.msra.mxu2 %v1334_v50  ;;  %v1438_v50 = vld [vmem:[%s421_s15] ss:$0 sm:$0xff] }
  0x5a   : > { %712 = vmatpush.bf16.msra.mxu1 %v1342_v51  ;;  %1412 = vmatpush.bf16.msra.mxu3 %v1342_v51 }
  0x5c   : > { %664 = vmatmul.bf16.vlgmr.msra.gmra.mxu0 %v1189_v56  ;;  %684 = vmatmul.bf16.vlgmr.msra.gmra.mxu2 %v1221_v58 }
  0x5d   : > { %713 = vmatmul.bf16.vlgmr.msra.gmra.mxu1 %v1193_v57  ;;  %733 = vmatmul.bf16.vlgmr.msra.gmra.mxu3 %v1225_v59 }
  0x6c   : > { %669 = vmatmul.bf16.gmra.mxu0 %v1197_v4  ;;  %689 = vmatmul.bf16.gmra.mxu2 %v1229_v6 }
  0x6d   : > { %718 = vmatmul.bf16.gmra.mxu1 %v1201_v5  ;;  %738 = vmatmul.bf16.gmra.mxu3 %v1233_v7 }
  0x7c   : > { %674 = vmatmul.bf16.gmra.mxu0 %v1205_v16  ;;  %694 = vmatmul.bf16.gmra.mxu2 %v1237_v18 }
  0x7d   : > { %723 = vmatmul.bf16.gmra.mxu1 %v1209_v17  ;;  %743 = vmatmul.bf16.gmra.mxu3 %v1241_v19 }
  0x8c   : > { %679 = vmatmul.bf16.gmra.mxu0 %v1213_v28  ;;  %699 = vmatmul.bf16.gmra.mxu2 %v1245_v30 }
  0x8d   : > { %728 = vmatmul.bf16.gmra.mxu1 %v1217_v29  ;;  %748 = vmatmul.bf16.gmra.mxu3 %v1249_v31  ;;  %v1469_v29 = vmov 128.0  }
  0x8e   : > { %1441 = vrcp.f32 %v1469_v29 }
  0xd9   : > { %v665_v32 = vpop.f32.mrf.mxu0 }
  0xda   : > { %v714_v33 = vpop.f32.mrf.mxu1  ;;  %v666_v56 = vadd.f32 %v1438_v50, %v665_v32 }
  0xdc   : > { %v1751_v60 = vadd.f32 %v714_v33, %v666_v56 }
  0xdf   : > { %v685_v34 = vpop.f32.mrf.mxu2 }
  0xe0   : > { %v734_v35 = vpop.f32.mrf.mxu3  ;;  %v686_v14 = vadd.f32 %v1438_v50, %v685_v34 }
  0xe1   : > { %v667_v36 = vpop.f32.mrf.mxu0 }
  0xe2   : > { %v716_v37 = vpop.f32.mrf.mxu1  ;;  %v668_v54 = vadd.f32 %v1438_v50, %v667_v36  ;;  %v735_v22 = vadd.f32 %v734_v35, %v686_v14 }
  0xe4   : > { %v1749_v58 = vadd.f32 %v716_v37, %v668_v54 }
  0xe6   : > { %v754_v2 = vadd.f32 %v1749_v58, %v1751_v60 }
  0xe7   : > { %v687_v38 = vpop.f32.mrf.mxu2 }
  0xe8   : > { %v736_v39 = vpop.f32.mrf.mxu3  ;;  %v688_v19 = vadd.f32 %v1438_v50, %v687_v38  ;;  %v1442_v38 = vpop.eup %1441 }
  0xe9   : > { %v670_v40 = vpop.f32.mrf.mxu0  ;;  %vm780_vm0 = vweird.f32 %v1442_v38 }
  0xea   : > { %v719_v41 = vpop.f32.mrf.mxu1  ;;  %v671_v57 = vadd.f32 %v1438_v50, %v670_v40  ;;  %v737_v26 = vadd.f32 %v736_v39, %v688_v19  ;;  %v776_v39 = vmul.f32 128.0, %v1442_v38 }
  0xec   : > { %v1753_v61 = vadd.f32 %v719_v41, %v671_v57 }
  0xee   : > { %v755_v5 = vadd.f32 %v754_v2, %v1753_v61 }
  0xef   : > { %v690_v42 = vpop.f32.mrf.mxu2 }
  0xf0   : > { %v739_v43 = vpop.f32.mrf.mxu3  ;;  %v691_v23 = vadd.f32 %v1438_v50, %v690_v42 }
  0xf1   : > { %v672_v44 = vpop.f32.mrf.mxu0 }
  0xf2   : > { %v721_v45 = vpop.f32.mrf.mxu1  ;;  %v673_v59 = vadd.f32 %v1438_v50, %v672_v44  ;;  %v740_v30 = vadd.f32 %v739_v43, %v691_v23  ;;  %v777_v43 = vsub.f32 1.0, %v776_v39 }
  0xf4   : > { %v1757_v3 = vadd.f32 %v721_v45, %v673_v59 }
  0xf6   : > { %v756_v9 = vadd.f32 %v755_v5, %v1757_v3 }
  0xf7   : > { %v692_v46 = vpop.f32.mrf.mxu2 }
  0xf8   : > { %v741_v47 = vpop.f32.mrf.mxu3  ;;  %v693_v27 = vadd.f32 %v1438_v50, %v692_v46 }
  0xf9   : > { %v675_v48 = vpop.f32.mrf.mxu0 }
  0xfa   : > { %v724_v49 = vpop.f32.mrf.mxu1  ;;  %v676_v62 = vadd.f32 %v1438_v50, %v675_v48  ;;  %v742_v33 = vadd.f32 %v741_v47, %v693_v27  ;;  %v778_v47 = vmul.f32 %v1442_v38, %v777_v43 }
  0xfc   : > { %v1760_v6 = vadd.f32 %v724_v49, %v676_v62  ;;  %v779_v59 = vadd.f32 %v1442_v38, %v778_v47 }
  0xfe   : > { %v757_v11 = vadd.f32 %v756_v9, %v1760_v6 }
  0xff   : > { %v695_v51 = vpop.f32.mrf.mxu2 }
 0x100   : > { %v744_v55 = vpop.f32.mrf.mxu3  ;;  %v696_v31 = vadd.f32 %v1438_v50, %v695_v51 }
 0x101   : > { %v677_v52 = vpop.f32.mrf.mxu0 }
 0x102   : > { %v726_v53 = vpop.f32.mrf.mxu1  ;;  %v678_v4 = vadd.f32 %v1438_v50, %v677_v52  ;;  %v745_v40 = vadd.f32 %v744_v55, %v696_v31 }
 0x104   : > { %v1763_v10 = vadd.f32 %v726_v53, %v678_v4 }
 0x106   : > { %v758_v15 = vadd.f32 %v757_v11, %v1763_v10 }
 0x107   : > { %v697_v63 = vpop.f32.mrf.mxu2 }
 0x108   : > { %v746_v8 = vpop.f32.mrf.mxu3  ;;  %v698_v34 = vadd.f32 %v1438_v50, %v697_v63  ;;  %v781_v63 = vsel %vm780_vm0, %v1442_v38, %v779_v59 }
 0x109   : > { %v680_v0 = vpop.f32.mrf.mxu0 }
 0x10a   : > { %v729_v1 = vpop.f32.mrf.mxu1  ;;  %v681_v7 = vadd.f32 %v1438_v50, %v680_v0  ;;  %v747_v35 = vadd.f32 %v746_v8, %v698_v34 }
 0x10c   : > { %v1766_v12 = vadd.f32 %v729_v1, %v681_v7 }
 0x10e   : > { %v759_v20 = vadd.f32 %v758_v15, %v1766_v12 }
 0x10f   : > { %v700_v17 = vpop.f32.mrf.mxu2 }
 0x110   : > { %v749_v25 = vpop.f32.mrf.mxu3  ;;  %v701_v41 = vadd.f32 %v1438_v50, %v700_v17 }
 0x111   : > { %v682_v13 = vpop.f32.mrf.mxu0 }
 0x112   : > { %v683_v16 = vadd.f32 %v1438_v50, %v682_v13  ;;  %v731_v18 = vpop.f32.mrf.mxu1  ;;  %v750_v46 = vadd.f32 %v749_v25, %v701_v41 }
 0x114   : > { %v732_v21 = vadd.f32 %v731_v18, %v683_v16 }
 0x116   : > { %v760_v24 = vadd.f32 %v759_v20, %v732_v21 }
 0x117   : > { %v702_v37 = vpop.f32.mrf.mxu2 }
 0x118   : > { %v761_v28 = vadd.f32 %v760_v24, %v735_v22  ;;  %v703_v45 = vadd.f32 %v1438_v50, %v702_v37  ;;  %v751_v48 = vpop.f32.mrf.mxu3 }
 0x11a   : > { %v762_v32 = vadd.f32 %v761_v28, %v737_v26  ;;  %v752_v53 = vadd.f32 %v751_v48, %v703_v45 }
 0x11c   : > { %v763_v36 = vadd.f32 %v762_v32, %v740_v30 }
 0x11e   : > { %v764_v44 = vadd.f32 %v763_v36, %v742_v33 }
 0x120   : > { %v765_v42 = vadd.f32 %v764_v44, %v745_v40 }
 0x122   : > { %v766_v49 = vadd.f32 %v765_v42, %v747_v35 }
 0x124   : > { %v767_v52 = vadd.f32 %v766_v49, %v750_v46 }
 0x126   : > { %v768_v51 = vadd.f32 %v767_v52, %v752_v53 }
 0x128   : > { %v769_v54 = vrot.slane %v768_v51, 4 }
 0x12a   : > { %v770_v56 = vadd.f32 %v769_v54, %v768_v51 }
 0x12c   : > { %v771_v57 = vrot.slane %v770_v56, 2 }
 0x12e   : > { %v772_v62 = vadd.f32 %v771_v57, %v770_v56 }
 0x130   : > { %v773_v55 = vrot.slane %v772_v62, 1 }
 0x132   : > { %v774_v0 = vadd.f32 %v773_v55, %v772_v62 }
 0x134   : > { %v782_v1 = vmul.f32 %v781_v63, %v774_v0 }
 0x136   : > { %v1771_v50 = vsub.f32 %v1751_v60, %v782_v1  ;;  %v1774_v2 = vsub.f32 %v1749_v58, %v782_v1  ;;  %v1777_v4 = vsub.f32 %v1753_v61, %v782_v1  ;;  %v786_v8 = vsub.f32 %v1757_v3, %v782_v1 }
 0x137   : > { %v1785_v9 = vsub.f32 %v1760_v6, %v782_v1  ;;  %v1790_v58 = vsub.f32 %v1763_v10, %v782_v1  ;;  %v789_v14 = vsub.f32 %v1766_v12, %v782_v1  ;;  %v790_v17 = vsub.f32 %v732_v21, %v782_v1 }
 0x138   : > { %v799_v5 = vmul.f32 %v1771_v50, %v1771_v50  ;;  %v800_v7 = vmul.f32 %v1774_v2, %v1774_v2  ;;  %v801_v60 = vmul.f32 %v1777_v4, %v1777_v4  ;;  %v802_v61 = vmul.f32 %v786_v8, %v786_v8 }
 0x139   : > { %v803_v15 = vmul.f32 %v1785_v9, %v1785_v9  ;;  %v804_v3 = vmul.f32 %v1790_v58, %v1790_v58  ;;  %v791_v18 = vsub.f32 %v735_v22, %v782_v1  ;;  %v805_v19 = vmul.f32 %v789_v14, %v789_v14 }
 0x13a   : > { %v815_v11 = vadd.f32 %v800_v7, %v799_v5  ;;  %v792_v23 = vsub.f32 %v737_v26, %v782_v1  ;;  %v806_v24 = vmul.f32 %v790_v17, %v790_v17  ;;  %v793_v25 = vsub.f32 %v740_v30, %v782_v1 }
 0x13b   : > { %v807_v27 = vmul.f32 %v791_v18, %v791_v18  ;;  %v794_v29 = vsub.f32 %v742_v33, %v782_v1  ;;  %v795_v32 = vsub.f32 %v745_v40, %v782_v1  ;;  %v796_v21 = vsub.f32 %v747_v35, %v782_v1 }
 0x13c   : > { %v816_v13 = vadd.f32 %v815_v11, %v801_v60  ;;  %v808_v12 = vmul.f32 %v792_v23, %v792_v23  ;;  %v809_v34 = vmul.f32 %v793_v25, %v793_v25  ;;  %v797_v41 = vsub.f32 %v750_v46, %v782_v1  ;;  %v1439_v60 = vld [vmem:[%s424_s20] ss:$0 sm:$0xff] }
 0x13d   : > { %v810_v37 = vmul.f32 %v794_v29, %v794_v29  ;;  %v811_v44 = vmul.f32 %v795_v32, %v795_v32  ;;  %v798_v42 = vsub.f32 %v752_v53, %v782_v1  ;;  %v812_v45 = vmul.f32 %v796_v21, %v796_v21 }
 0x13e   : > { %v817_v16 = vadd.f32 %v816_v13, %v802_v61  ;;  %v813_v48 = vmul.f32 %v797_v41, %v797_v41 }
 0x13f   : > { %v814_v30 = vmul.f32 %v798_v42, %v798_v42 }
 0x140   : > { %v818_v6 = vadd.f32 %v817_v16, %v803_v15 }
 0x142   : > { %v819_v20 = vadd.f32 %v818_v6, %v804_v3 }
 0x144   : > { %v820_v10 = vadd.f32 %v819_v20, %v805_v19 }
 0x146   : > { %v821_v28 = vadd.f32 %v820_v10, %v806_v24 }
 0x148   : > { %v822_v31 = vadd.f32 %v821_v28, %v807_v27 }
 0x14a   : > { %v823_v36 = vadd.f32 %v822_v31, %v808_v12 }
 0x14c   : > { %v824_v38 = vadd.f32 %v823_v36, %v809_v34 }
 0x14e   : > { %v825_v22 = vadd.f32 %v824_v38, %v810_v37 }
 0x150   : > { %v826_v26 = vadd.f32 %v825_v22, %v811_v44 }
 0x152   : > { %v827_v39 = vadd.f32 %v826_v26, %v812_v45 }
 0x154   : > { %v828_v49 = vadd.f32 %v827_v39, %v813_v48 }
 0x156   : > { %v829_v52 = vadd.f32 %v828_v49, %v814_v30 }
 0x158   : > { %v830_v33 = vrot.slane %v829_v52, 4 }
 0x15a   : > { %v831_v43 = vadd.f32 %v830_v33, %v829_v52 }
 0x15c   : > { %v832_v51 = vrot.slane %v831_v43, 2 }
 0x15e   : > { %v833_v40 = vadd.f32 %v832_v51, %v831_v43 }
 0x160   : > { %v834_v54 = vrot.slane %v833_v40, 1 }
 0x162   : > { %v835_v47 = vadd.f32 %v834_v54, %v833_v40 }
 0x164   : > { %v836_v35 = vmul.f32 %v835_v47, %v781_v63 }
 0x166   : > { %v837_v56 = vadd.f32 1e-05, %v836_v35 }
 0x168   : > { %1443 = vrsqrt.f32 %v837_v56  ;;  %vm844_vm2 = vweird.f32 %v837_v56 }
 0x16e   : > { %v1444_v46 = vpop.eup %1443 }
 0x16f   : > { %v839_v57 = vmul.f32 %v1444_v46, %v837_v56  ;;  %vm845_vm1 = vweird.f32 %v1444_v46 }
 0x170   : > { %vm846_vm3 = vmor %vm844_vm2, %vm845_vm1 }
 0x171   : > { %v840_v53 = vmul.f32 %v1444_v46, %v839_v57 }
 0x173   : > { %v841_v59 = vmul.f32 0.5, %v840_v53 }
 0x175   : > { %v842_v62 = vsub.f32 1.5, %v841_v59 }
 0x177   : > { %v843_v55 = vmul.f32 %v1444_v46, %v842_v62 }
 0x179   : > { %v847_v0 = vsel %vm846_vm3, %v1444_v46, %v843_v55 }
 0x17a   : > { %v851_v1 = vmul.f32 %v847_v0, %v786_v8  ;;  %v848_v5 = vmul.f32 %v847_v0, %v1771_v50  ;;  %v849_v7 = vmul.f32 %v847_v0, %v1774_v2  ;;  %v850_v63 = vmul.f32 %v847_v0, %v1777_v4 }
 0x17b   : > { %v852_v11 = vmul.f32 %v847_v0, %v1785_v9  ;;  %v853_v61 = vmul.f32 %v847_v0, %v1790_v58  ;;  %v854_v13 = vmul.f32 %v847_v0, %v789_v14  ;;  %v855_v15 = vmul.f32 %v847_v0, %v790_v17  ;;  %v1440_v9 = vld [vmem:[%s427_s27] ss:$0 sm:$0xff] }
 0x17c   : > { %v856_v16 = vmul.f32 %v847_v0, %v791_v18  ;;  %v857_v8 = vmul.f32 %v847_v0, %v792_v23  ;;  %v858_v3 = vmul.f32 %v847_v0, %v793_v25  ;;  %v859_v50 = vmul.f32 %v847_v0, %v794_v29 }
 0x17d   : > { %v860_v6 = vmul.f32 %v847_v0, %v795_v32  ;;  %v861_v2 = vmul.f32 %v847_v0, %v796_v21  ;;  %v862_v19 = vmul.f32 %v847_v0, %v797_v41  ;;  %v868_v4 = vmul.f32 %v1439_v60, %v848_v5 }
 0x17e   : > { %v869_v20 = vmul.f32 %v1439_v60, %v849_v7  ;;  %v870_v24 = vmul.f32 %v1439_v60, %v850_v63  ;;  %v871_v10 = vmul.f32 %v1439_v60, %v851_v1  ;;  %v872_v27 = vmul.f32 %v1439_v60, %v852_v11 }
 0x17f   : > { %v873_v58 = vmul.f32 %v1439_v60, %v853_v61  ;;  %v874_v14 = vmul.f32 %v1439_v60, %v854_v13  ;;  %v875_v17 = vmul.f32 %v1439_v60, %v855_v15  ;;  %v876_v18 = vmul.f32 %v1439_v60, %v856_v16 }
 0x180   : > { %v877_v23 = vmul.f32 %v1439_v60, %v857_v8  ;;  %v878_v25 = vmul.f32 %v1439_v60, %v858_v3  ;;  %v879_v28 = vmul.f32 %v1439_v60, %v859_v50  ;;  %v863_v29 = vmul.f32 %v847_v0, %v798_v42 }
 0x181   : > { %v880_v12 = vmul.f32 %v1439_v60, %v860_v6  ;;  %v881_v31 = vmul.f32 %v1439_v60, %v861_v2  ;;  %v882_v32 = vmul.f32 %v1439_v60, %v862_v19  ;;  %v888_v34 = vadd.f32 %v1440_v9, %v868_v4 }
 0x182   : > { %v889_v36 = vadd.f32 %v1440_v9, %v869_v20  ;;  %v890_v21 = vadd.f32 %v1440_v9, %v870_v24  ;;  %v891_v37 = vadd.f32 %v1440_v9, %v871_v10  ;;  %v892_v38 = vadd.f32 %v1440_v9, %v872_v27 }
 0x183   : > { %v893_v41 = vadd.f32 %v1440_v9, %v873_v58  ;;  %v894_v44 = vadd.f32 %v1440_v9, %v874_v14  ;;  %v895_v22 = vadd.f32 %v1440_v9, %v875_v17  ;;  %v896_v45 = vadd.f32 %v1440_v9, %v876_v18 }
 0x184   : > { %v897_v26 = vadd.f32 %v1440_v9, %v877_v23  ;;  %v898_v48 = vadd.f32 %v1440_v9, %v878_v25  ;;  %v899_v39 = vadd.f32 %v1440_v9, %v879_v28  ;;  %v883_v30 = vmul.f32 %v1439_v60, %v863_v29 }
 0x185   : > { %v900_v49 = vadd.f32 %v1440_v9, %v880_v12  ;;  %v901_v52 = vadd.f32 %v1440_v9, %v881_v31  ;;  %v902_v42 = vadd.f32 %v1440_v9, %v882_v32  ;;  %vm904_vm4 = vcmp.ge.f32.partialorder %v888_v34, 0.0 }
 0x186   : > { %vm905_vm5 = vcmp.ge.f32.partialorder %v889_v36, 0.0  ;;  %vm906_vm6 = vcmp.ge.f32.partialorder %v890_v21, 0.0  ;;  %vm907_vm7 = vcmp.ge.f32.partialorder %v891_v37, 0.0  ;;  %vm908_vm8 = vcmp.ge.f32.partialorder %v892_v38, 0.0 }
 0x187   : > { %vm909_vm9 = vcmp.ge.f32.partialorder %v893_v41, 0.0  ;;  %vm910_vm10 = vcmp.ge.f32.partialorder %v894_v44, 0.0  ;;  %vm911_vm11 = vcmp.ge.f32.partialorder %v895_v22, 0.0  ;;  %vm912_vm12 = vcmp.ge.f32.partialorder %v896_v45, 0.0 }
 0x188   : > { %vm913_vm13 = vcmp.ge.f32.partialorder %v897_v26, 0.0  ;;  %vm914_vm14 = vcmp.ge.f32.partialorder %v898_v48, 0.0  ;;  %vm915_vm15 = vcmp.ge.f32.partialorder %v899_v39, 0.0  ;;  %vm916_vm0 = vcmp.ge.f32.partialorder %v900_v49, 0.0 }
 0x189   : > { %vm917_vm1 = vcmp.ge.f32.partialorder %v901_v52, 0.0  ;;  %v920_v33 = vmul.f32 0.01, %v888_v34  ;;  %v921_v43 = vmul.f32 0.01, %v889_v36  ;;  %v903_v51 = vadd.f32 %v1440_v9, %v883_v30 }
 0x18a   : > { %v922_v40 = vmul.f32 0.01, %v890_v21  ;;  %v923_v54 = vmul.f32 0.01, %v891_v37  ;;  %v924_v47 = vmul.f32 0.01, %v892_v38 }
 0x18b   : > { %v925_v35 = vmul.f32 0.01, %v893_v41  ;;  %v926_v56 = vmul.f32 0.01, %v894_v44  ;;  %v927_v46 = vmul.f32 0.01, %v895_v22  ;;  %v936_v62 = vsel %vm904_vm4, %v888_v34, %v920_v33 }
 0x18c   : > { %v928_v57 = vmul.f32 0.01, %v896_v45  ;;  %v929_v53 = vmul.f32 0.01, %v897_v26  ;;  %v930_v59 = vmul.f32 0.01, %v898_v48  ;;  %v937_v5 = vsel %vm905_vm5, %v889_v36, %v921_v43 }
 0x18d   : > { %v931_v55 = vmul.f32 0.01, %v899_v39  ;;  %v932_v0 = vmul.f32 0.01, %v900_v49  ;;  %v933_v1 = vmul.f32 0.01, %v901_v52  ;;  %v938_v60 = vsel %vm906_vm6, %v890_v21, %v922_v40 }
 0x18e   : > { %v934_v7 = vmul.f32 0.01, %v902_v42  ;;  %v935_v63 = vmul.f32 0.01, %v903_v51  ;;  %v939_v11 = vsel %vm907_vm7, %v891_v37, %v923_v54  ;;  %v940_v61 = vsel %vm908_vm8, %v892_v38, %v924_v47 }
 0x18f   : > { %v941_v13 = vsel %vm909_vm9, %v893_v41, %v925_v35  ;;  %v942_v15 = vsel %vm910_vm10, %v894_v44, %v926_v56  ;;  %v943_v16 = vsel %vm911_vm11, %v895_v22, %v927_v46  ;;  %vm918_vm2 = vcmp.ge.f32.partialorder %v902_v42, 0.0 }
 0x190   : > { %vm919_vm3 = vcmp.ge.f32.partialorder %v903_v51, 0.0  ;;  %v944_v8 = vsel %vm912_vm12, %v896_v45, %v928_v57  ;;  %v945_v3 = vsel %vm913_vm13, %v897_v26, %v929_v53  ;;  %v946_v50 = vsel %vm914_vm14, %v898_v48, %v930_v59 }
 0x191   : > { %v947_v6 = vsel %vm915_vm15, %v899_v39, %v931_v55  ;;  %v1353_v2 = vpack.c.bf16 %v937_v5, %v936_v62  ;;  %v1358_v19 = vpack.c.bf16 %v939_v11, %v938_v60  ;;  %v948_v4 = vsel %vm916_vm0, %v900_v49, %v932_v0 }
 0x192   : > { %v949_v20 = vsel %vm917_vm1, %v901_v52, %v933_v1  ;;  %v1363_v24 = vpack.c.bf16 %v941_v13, %v940_v61  ;;  %v1368_v10 = vpack.c.bf16 %v943_v16, %v942_v15  ;;  %v950_v9 = vsel %vm918_vm2, %v902_v42, %v934_v7 }
 0x193   : > { %v951_v27 = vsel %vm919_vm3, %v903_v51, %v935_v63  ;;  %1354 = vst [vmem:[%s1831_s18] sm:$0xff] %v1353_v2   ;;  %v1373_v58 = vpack.c.bf16 %v945_v3, %v944_v8  ;;  %v1378_v14 = vpack.c.bf16 %v947_v6, %v946_v50  ;;  %v1383_v17 = vpack.c.bf16 %v949_v20, %v948_v4 }
 0x194   : > { %1390 = vst [vmem:[%s1831_s18 + $0x8] sm:$0xff] %v1358_v19   ;;  %v1388_v18 = vpack.c.bf16 %v951_v27, %v950_v9 }
 0x195   : > { %1391 = vst [vmem:[%s1831_s18 + $0x10] sm:$0xff] %v1363_v24  }
 0x196   : > { %1392 = vst [vmem:[%s1831_s18 + $0x18] sm:$0xff] %v1368_v10   ;;  %990 = sbr.rel (!%p1531_p5) target bundleno = 427 (0x1ab), region = 85 }
 0x197   : > { %1393 = vst [vmem:[%s1831_s18 + $0x20] sm:$0xff] %v1373_v58  }
 0x198   : > { %1394 = vst [vmem:[%s1831_s18 + $0x28] sm:$0xff] %v1378_v14  }
 0x199   : > { %1395 = vst [vmem:[%s1831_s18 + $0x30] sm:$0xff] %v1383_v17  }
 0x19a   : > { %1396 = vst [vmem:[%s1831_s18 + $0x38] sm:$0xff] %v1388_v18   ;;  %v1009_v23 = vld [vmem:[%s1831_s18] sm:$0xf] (%p1531_p5)  ;;  %v1011_v25 = vld [vmem:[%s1831_s18 + $0x4] sm:$0xf] (%p1531_p5) }
 0x19b   : > { %v1013_v28 = vld [vmem:[%s1831_s18 + $0x8] sm:$0xf]  ;;  %1010 = vst [vmem:[%s992_s13] sm:$0xf] %v1009_v23  ;;  %v1015_v29 = vld [vmem:[%s1831_s18 + $0xc] sm:$0xf] }
 0x19c   : > { %1012 = vst [vmem:[%s992_s13 + $0x8] sm:$0xf] %v1011_v25  ;;  %v1017_v12 = vld [vmem:[%s1831_s18 + $0x10] sm:$0xf]  ;;  %v1019_v31 = vld [vmem:[%s1831_s18 + $0x14] sm:$0xf] }
 0x19d   : > { %1014 = vst [vmem:[%s992_s13 + $0x10] sm:$0xf] %v1013_v28  ;;  %v1021_v32 = vld [vmem:[%s1831_s18 + $0x18] sm:$0xf]  ;;  %v1023_v34 = vld [vmem:[%s1831_s18 + $0x1c] sm:$0xf] }
 0x19e   : > { %1016 = vst [vmem:[%s992_s13 + $0x18] sm:$0xf] %v1015_v29  ;;  %v1025_v36 = vld [vmem:[%s1831_s18 + $0x20] sm:$0xf]  ;;  %v1027_v21 = vld [vmem:[%s1831_s18 + $0x24] sm:$0xf] }
 0x19f   : > { %1018 = vst [vmem:[%s992_s13 + $0x20] sm:$0xf] %v1017_v12  ;;  %v1029_v37 = vld [vmem:[%s1831_s18 + $0x28] sm:$0xf]  ;;  %v1031_v38 = vld [vmem:[%s1831_s18 + $0x2c] sm:$0xf] }
 0x1a0   : > { %1020 = vst [vmem:[%s992_s13 + $0x28] sm:$0xf] %v1019_v31  ;;  %v1033_v41 = vld [vmem:[%s1831_s18 + $0x30] sm:$0xf]  ;;  %v1035_v44 = vld [vmem:[%s1831_s18 + $0x34] sm:$0xf] }
 0x1a1   : > { %1022 = vst [vmem:[%s992_s13 + $0x30] sm:$0xf] %v1021_v32  ;;  %v1037_v22 = vld [vmem:[%s1831_s18 + $0x38] sm:$0xf]  ;;  %v1039_v45 = vld [vmem:[%s1831_s18 + $0x3c] sm:$0xf] }
 0x1a2   : > { %1024 = vst [vmem:[%s992_s13 + $0x38] sm:$0xf] %v1023_v34 }
 0x1a3   : > { %1026 = vst [vmem:[%s992_s13 + $0x40] sm:$0xf] %v1025_v36 }
 0x1a4   : > { %1028 = vst [vmem:[%s992_s13 + $0x48] sm:$0xf] %v1027_v21 }
 0x1a5   : > { %1030 = vst [vmem:[%s992_s13 + $0x50] sm:$0xf] %v1029_v37 }
 0x1a6   : > { %1032 = vst [vmem:[%s992_s13 + $0x58] sm:$0xf] %v1031_v38 }
 0x1a7   : > { %1034 = vst [vmem:[%s992_s13 + $0x60] sm:$0xf] %v1033_v41 }
 0x1a8   : > { %1036 = vst [vmem:[%s992_s13 + $0x68] sm:$0xf] %v1035_v44 }
 0x1a9   : > { %1038 = vst [vmem:[%s992_s13 + $0x70] sm:$0xf] %v1037_v22 }
 0x1aa   : > { %1040 = vst [vmem:[%s992_s13 + $0x78] sm:$0xf] %v1039_v45 }
 0x1ab PF: > { %p12_p11 = scmp.ge.s32.totalorder %s1519_s22, 4   ;;  %s1880_s18 = smov %s1463_s19 }
 0x1ac   : > { %s1881_s19 = smov %s1529_s25  ;;  %s1882_s20 = smov %s1519_s22 }
 0x1ad   :  { %14 = sbr.rel (!%p12_p11) target bundleno = 2 (0x2), region = 166 }

</bundles_post_ra>
